<compile_context>
chip_gen: v7x
topology: tpu7x:2x2x1
jax: 0.10.0
libtpu: 0.0.40
codegen_flags: <defaults>
</compile_context>

<pallas_src>
import functools
import math

import jax
import jax.numpy as jnp
from jax.experimental import pallas as pl
from jax.experimental.pallas import tpu as pltpu


# ----------------------------------------------------------------------------
# helpers
# ----------------------------------------------------------------------------
def _pick_tile(dim, pref, quantum):
    """Largest tile <= pref that divides `dim` and is a multiple of `quantum`;
    falls back to the full dim (block == array extent is always legal)."""
    if dim <= pref:
        return dim
    t = (pref // quantum) * quantum
    while t >= quantum:
        if dim % t == 0:
            return t
        t -= quantum
    return dim


def _const_spec(shape):
    """BlockSpec for a weight that is identical for every grid step (1-D grid)."""
    if len(shape) == 2:
        return pl.BlockSpec(shape, lambda b: (0, 0))
    return pl.BlockSpec(shape, lambda b: (0, 0, 0))


def _layer_norm(y, g, b, eps=1e-5):
    """LayerNorm over the last dim (f32 math, eps matches PyTorch)."""
    mu = jnp.mean(y, axis=-1, keepdims=True)
    yc = y - mu
    var = jnp.mean(yc * yc, axis=-1, keepdims=True)
    return yc * jax.lax.rsqrt(var + eps) * g + b


# ----------------------------------------------------------------------------
# Tiled linear with fused epilogue (bias [+ addend] [+ ReLU])
# ----------------------------------------------------------------------------
def _tiled_linear_kernel(*refs, activation, k_steps, has_add):
    if has_add:
        x_ref, w_ref, b_ref, add_ref, o_ref, acc_ref = refs
    else:
        x_ref, w_ref, b_ref, o_ref, acc_ref = refs
        add_ref = None

    @pl.when(pl.program_id(2) == 0)
    def _init():
        acc_ref[...] = jnp.zeros_like(acc_ref)

    acc_ref[...] += jnp.dot(
        x_ref[...].astype(jnp.bfloat16),
        w_ref[...].astype(jnp.bfloat16),
        preferred_element_type=jnp.float32,
    )

    @pl.when(pl.program_id(2) == k_steps - 1)
    def _finalize():
        r = acc_ref[...] + b_ref[...].astype(jnp.float32)
        if has_add:
            r = r + add_ref[...].astype(jnp.float32)
        if activation == "relu":
            r = jnp.maximum(r, 0.0)
        o_ref[...] = r.astype(o_ref.dtype)


def tiled_linear(x, w, b, addend=None, activation="none", tm=256, tn=256, tk=512):
    """(M, K) @ (K, N) + b [+ addend] [ReLU] -> (M, N) f32, tiled over (M, N, K)."""
    M, K = x.shape
    K2, N = w.shape
    assert K == K2
    b = b.reshape(1, N)
    tm = _pick_tile(M, tm, 8)
    tn = _pick_tile(N, tn, 128)
    tk = _pick_tile(K, tk, 128)
    gm, gn, gk = M // tm, N // tn, K // tk
    has_add = addend is not None

    kernel = functools.partial(
        _tiled_linear_kernel, activation=activation, k_steps=gk, has_add=has_add)

    in_specs = [
        pl.BlockSpec((tm, tk), lambda i, j, k: (i, k)),
        pl.BlockSpec((tk, tn), lambda i, j, k: (k, j)),
        pl.BlockSpec((1, tn), lambda i, j, k: (0, j)),
    ]
    args = [x, w, b]
    if has_add:
        in_specs.append(pl.BlockSpec((tm, tn), lambda i, j, k: (i, j)))
        args.append(addend)

    return pl.pallas_call(
        kernel,
        out_shape=jax.ShapeDtypeStruct((M, N), jnp.float32),
        grid=(gm, gn, gk),
        in_specs=in_specs,
        out_specs=pl.BlockSpec((tm, tn), lambda i, j, k: (i, j)),
        scratch_shapes=[pltpu.VMEM((tm, tn), jnp.float32)],
        compiler_params=pltpu.CompilerParams(
            dimension_semantics=("parallel", "parallel", "arbitrary")),
    )(*args)


# ----------------------------------------------------------------------------
# Fused multi-head attention block: QKV proj + attention + out proj + residual + LN
# ----------------------------------------------------------------------------
def _mha_kernel(xq_ref, xkv_ref, wq_ref, wk_ref, wv_ref, bq_ref, bk_ref, bv_ref,
                wo_ref, bo_ref, g_ref, beta_ref, o_ref, *, nhead, scale):
    xq = xq_ref[...]                                   # (Lq, D) f32 (also the residual)
    xkv = xkv_ref[...]                                 # (Lk, D) f32
    xq16 = xq.astype(jnp.bfloat16)
    xkv16 = xkv.astype(jnp.bfloat16)

    attn = None
    for h in range(nhead):                             # static unroll over heads
        q = jnp.dot(xq16, wq_ref[h], preferred_element_type=jnp.float32) + bq_ref[h]
        k = jnp.dot(xkv16, wk_ref[h], preferred_element_type=jnp.float32) + bk_ref[h]
        v = jnp.dot(xkv16, wv_ref[h], preferred_element_type=jnp.float32) + bv_ref[h]
        # scores = q @ k^T / sqrt(dh)  (MXU, f32 accumulate)
        s = jax.lax.dot_general(
            q.astype(jnp.bfloat16), k.astype(jnp.bfloat16),
            (((1,), (1,)), ((), ())),
            preferred_element_type=jnp.float32) * scale
        m = jnp.max(s, axis=-1, keepdims=True)
        p = jnp.exp(s - m)
        # softmax normalization on the EUP slot
        p = p * pl.reciprocal(jnp.sum(p, axis=-1, keepdims=True), approx=True)
        o_h = jnp.dot(p.astype(jnp.bfloat16), v.astype(jnp.bfloat16),
                      preferred_element_type=jnp.float32)            # (Lq, dh)
        # out-projection contribution of this head: o_h @ Wo[h*dh:(h+1)*dh, :]
        c = jnp.dot(o_h.astype(jnp.bfloat16), wo_ref[h],
                    preferred_element_type=jnp.float32)              # (Lq, D)
        attn = c if attn is None else attn + c

    y = xq + attn + bo_ref[...]
    o_ref[...] = _layer_norm(y, g_ref[...], beta_ref[...]).astype(o_ref.dtype)


def fused_mha(x, mem, ap, ln_g, ln_b, nhead):
    """x: (B, Lq, D) queries (+ residual), mem: (B, Lk, D) keys/values source."""
    B, Lq, D = x.shape
    Lk = mem.shape[1]
    dh = D // nhead
    kernel = functools.partial(_mha_kernel, nhead=nhead, scale=1.0 / math.sqrt(dh))
    return pl.pallas_call(
        kernel,
        out_shape=jax.ShapeDtypeStruct((B, Lq, D), jnp.float32),
        grid=(B,),
        in_specs=[
            pl.BlockSpec((None, Lq, D), lambda b: (b, 0, 0)),
            pl.BlockSpec((None, Lk, D), lambda b: (b, 0, 0)),
            _const_spec(ap["wq"].shape), _const_spec(ap["wk"].shape),
            _const_spec(ap["wv"].shape), _const_spec(ap["bq"].shape),
            _const_spec(ap["bk"].shape), _const_spec(ap["bv"].shape),
            _const_spec(ap["wo"].shape), _const_spec(ap["bo"].shape),
            _const_spec(ln_g.shape), _const_spec(ln_b.shape),
        ],
        out_specs=pl.BlockSpec((None, Lq, D), lambda b: (b, 0, 0)),
        compiler_params=pltpu.CompilerParams(dimension_semantics=("parallel",)),
    )(x, mem, ap["wq"], ap["wk"], ap["wv"], ap["bq"], ap["bk"], ap["bv"],
      ap["wo"], ap["bo"], ln_g, ln_b)


# ----------------------------------------------------------------------------
# Fused FFN block: linear1 + ReLU + linear2 + residual + LayerNorm
# ----------------------------------------------------------------------------
def _ffn_kernel(x_ref, w1_ref, b1_ref, w2_ref, b2_ref, g_ref, beta_ref, o_ref):
    x = x_ref[...]                                     # (S, D) f32 (also the residual)
    h = jnp.dot(x.astype(jnp.bfloat16), w1_ref[...].astype(jnp.bfloat16),
                preferred_element_type=jnp.float32) + b1_ref[...]
    h = jnp.maximum(h, 0.0)                            # hidden never leaves VMEM
    y = jnp.dot(h.astype(jnp.bfloat16), w2_ref[...].astype(jnp.bfloat16),
                preferred_element_type=jnp.float32) + b2_ref[...]
    o_ref[...] = _layer_norm(x + y, g_ref[...], beta_ref[...]).astype(o_ref.dtype)


def fused_ffn(x, w1, b1, w2, b2, ln_g, ln_b):
    B, S, D = x.shape
    return pl.pallas_call(
        _ffn_kernel,
        out_shape=jax.ShapeDtypeStruct((B, S, D), jnp.float32),
        grid=(B,),
        in_specs=[
            pl.BlockSpec((None, S, D), lambda b: (b, 0, 0)),
            _const_spec(w1.shape), _const_spec(b1.shape),
            _const_spec(w2.shape), _const_spec(b2.shape),
            _const_spec(ln_g.shape), _const_spec(ln_b.shape),
        ],
        out_specs=pl.BlockSpec((None, S, D), lambda b: (b, 0, 0)),
        compiler_params=pltpu.CompilerParams(dimension_semantics=("parallel",)),
    )(x, w1, b1, w2, b2, ln_g, ln_b)


# ----------------------------------------------------------------------------
# Model pieces
# ----------------------------------------------------------------------------
def decoder_layer(x, memory, lp, nhead):
    """Post-norm TransformerDecoderLayer (ReLU FFN, dropout=identity in eval)."""
    x = fused_mha(x, x, lp["self_attn"], lp["norm1_g"], lp["norm1_b"], nhead)
    x = fused_mha(x, memory, lp["cross_attn"], lp["norm2_g"], lp["norm2_b"], nhead)
    x = fused_ffn(x, lp["w1"], lp["b1"], lp["w2"], lp["b2"],
                  lp["norm3_g"], lp["norm3_b"])
    return x


def sinusoidal_pe(max_len, d_model):
    position = jnp.arange(max_len, dtype=jnp.float32)[:, None]
    div_term = jnp.exp(
        jnp.arange(0, d_model, 2, dtype=jnp.float32) * (-math.log(10000.0) / d_model))
    pe = jnp.zeros((max_len, d_model), jnp.float32)
    pe = pe.at[:, 0::2].set(jnp.sin(position * div_term))
    pe = pe.at[:, 1::2].set(jnp.cos(position * div_term))
    return pe


def init_params(key, D, nhead, num_layers, ff, spk_dim=256):
    dh = D // nhead
    wdt = jnp.bfloat16      # MXU weights stored bf16; accumulation stays f32

    def dense(k, fi, fo, scale=0.05):
        kw, kb = jax.random.split(k)
        w = jax.random.normal(kw, (fi, fo), jnp.float32) * scale
        b = jax.random.normal(kb, (fo,), jnp.float32) * 0.01
        return w, b

    def attn_params(k):
        ks = jax.random.split(k, 4)
        wq, bq = dense(ks[0], D, D)
        wk, bk = dense(ks[1], D, D)
        wv, bv = dense(ks[2], D, D)
        wo, bo = dense(ks[3], D, D)
        # Per-head layout so the fused kernel only needs leading-axis indexing:
        #   w*[h]: (D, dh) projection for head h;  wo[h]: (dh, D) out-proj rows of head h.
        to_heads_in = lambda w: w.reshape(D, nhead, dh).transpose(1, 0, 2).astype(wdt)
        to_heads_b = lambda b: b.reshape(nhead, 1, dh)
        return dict(
            wq=to_heads_in(wq), wk=to_heads_in(wk), wv=to_heads_in(wv),
            bq=to_heads_b(bq), bk=to_heads_b(bk), bv=to_heads_b(bv),
            wo=wo.reshape(nhead, dh, D).astype(wdt), bo=bo.reshape(1, D),
        )

    keys = jax.random.split(key, num_layers + 2)
    layers = []
    for li in range(num_layers):
        ks = jax.random.split(keys[li], 4)
        lp = dict(self_attn=attn_params(ks[0]), cross_attn=attn_params(ks[1]))
        w1, b1 = dense(ks[2], D, ff)
        w2, b2 = dense(ks[3], ff, D)
        lp["w1"], lp["b1"] = w1.astype(wdt), b1.reshape(1, ff)
        lp["w2"], lp["b2"] = w2.astype(wdt), b2.reshape(1, D)
        for n in ("norm1", "norm2", "norm3"):
            lp[n + "_g"] = jnp.ones((1, D), jnp.float32)
            lp[n + "_b"] = jnp.zeros((1, D), jnp.float32)
        layers.append(lp)
    spk_w, spk_b = dense(keys[-2], spk_dim, D)
    out_w, out_b = dense(keys[-1], D, D)
    return dict(layers=layers,
                spk_w=spk_w.astype(wdt), spk_b=spk_b,
                out_w=out_w.astype(wdt), out_b=out_b)


def speech_feature_decoder_forward(
    params,
    encoded_features,          # (S, B, D)  seq-first, like the PyTorch transformer
    target_speaker_features,   # (B, S, 256) batch-first
    pitch_features,            # (B, 1, S)
    wav_len,                   # (B,) lengths in samples
    slice_key,
    *,
    nhead,
    segment_size,              # hp.data.segment_size // hp.data.hop_length
    hop_length,
):
    S, B, D = encoded_features.shape

    # Internal layout is batch-first (B, S, D); mathematically identical to the
    # PyTorch seq-first flow (attention is per-batch, linear/LayerNorm per-token).
    enc = jnp.transpose(encoded_features, (1, 0, 2))                  # (B, S, D)

    # decoder_input = encoded + target_speaker_proj(speaker) + positional_encoding,
    # with both adds absorbed into the speaker-projection matmul epilogue.
    pe = sinusoidal_pe(S, D)                                          # compile-time const
    addend = (enc + pe[None, :, :]).reshape(B * S, D)
    Csp = target_speaker_features.shape[-1]
    x = tiled_linear(target_speaker_features.reshape(B * S, Csp),
                     params["spk_w"], params["spk_b"], addend=addend)
    x = x.reshape(B, S, D)

    for lp in params["layers"]:
        x = decoder_layer(x, enc, lp, nhead)

    out = tiled_linear(x.reshape(B * S, D), params["out_w"], params["out_b"])
    out = jnp.transpose(out.reshape(B, S, D), (0, 2, 1))              # (B, D, S)

    # torch.mean(target_speaker_features, dim=1): tiny reduction -> plain JAX.
    spk_mean = jnp.mean(target_speaker_features, axis=1)              # (B, 256)

    # commons.rand_slice_segments_with_pitch (deterministic jax.random key)
    x_lengths = wav_len / float(hop_length)
    ids_str_max = jnp.maximum(x_lengths - segment_size + 1, 1.0)
    ids_str = (jax.random.uniform(slice_key, (B,)) * ids_str_max).astype(jnp.int32)

    def slice_one(o, pch, s):
        return (jax.lax.dynamic_slice_in_dim(o, s, segment_size, axis=-1),
                jax.lax.dynamic_slice_in_dim(pch, s, segment_size, axis=-1))

    x_slice, p_slice = jax.vmap(slice_one)(out, pitch_features, ids_str)

    # TODO(synk): self.dec = Generator(hp) (HiFi-GAN-style vocoder) is external to this
    # module and has no definition here; returning its inputs (sliced features, sliced
    # pitch, speaker embedding) plus ids_str instead of synthesized audio.
    return x_slice, p_slice, spk_mean, ids_str


# ----------------------------------------------------------------------------
# Demo
# ----------------------------------------------------------------------------
if __name__ == "__main__":
    S, B, D = 8, 2, 32             # seq, batch, feature_size
    NHEAD, NLAYERS, FF = 4, 2, 64  # nhead, num_decoder_layers, dim_feedforward
    HOP = 256
    SEGMENT_SAMPLES = 1024
    SEG = SEGMENT_SAMPLES // HOP   # hp.data.segment_size // hp.data.hop_length = 4

    root = jax.random.PRNGKey(0)
    kp, k1, k2, k3, ks = jax.random.split(root, 5)

    params = init_params(kp, D, NHEAD, NLAYERS, FF)
    encoded_features = jax.random.normal(k1, (S, B, D), jnp.float32)
    target_speaker_features = jax.random.normal(k2, (B, S, 256), jnp.float32)
    pitch_features = jax.random.normal(k3, (B, 1, S), jnp.float32)
    wav_len = jnp.array([S * HOP, S * HOP], jnp.float32)

    fwd = jax.jit(functools.partial(
        speech_feature_decoder_forward,
        nhead=NHEAD, segment_size=SEG, hop_length=HOP))

    outs = fwd(params, encoded_features, target_speaker_features,
               pitch_features, wav_len, ks)
    jax.block_until_ready(outs)
    x_slice, p_slice, spk_mean, ids_str = outs

    assert x_slice.shape == (B, D, SEG)
    assert p_slice.shape == (B, 1, SEG)
    assert spk_mean.shape == (B, 256)
    assert ids_str.shape == (B,)
    assert bool(jnp.all(jnp.isfinite(x_slice)))
    assert bool(jnp.all(jnp.isfinite(p_slice)))
    assert bool(jnp.all(jnp.isfinite(spk_mean)))
    print("KERNEL_OK")
</pallas_src>

<mosaic_0001>
module attributes {stable_mosaic.version = 11 : i64} {
  func.func @_tiled_linear_kernel(%arg0: i32, %arg1: i32, %arg2: i32, %arg3: memref<16x256xf32, #tpu.memory_space<vmem>>, %arg4: memref<256x32xbf16, #tpu.memory_space<vmem>>, %arg5: memref<1x32xf32, #tpu.memory_space<vmem>>, %arg6: memref<16x32xf32, #tpu.memory_space<vmem>>, %arg7: memref<16x32xf32, #tpu.memory_space<vmem>>, %arg8: memref<16x32xf32, #tpu.memory_space<vmem>>) attributes {dimension_semantics = [#tpu.dimension_semantics<parallel>, #tpu.dimension_semantics<parallel>, #tpu.dimension_semantics<arbitrary>], iteration_bounds = array<i64: 1, 1, 1>, scalar_prefetch = 0 : i64, scratch_operands = 1 : i64, tpu.core_type = #tpu.core_type<tc>, window_params = [{transform_indices = @transform_0, window_bounds = array<i64: 16, 256>}, {transform_indices = @transform_1, window_bounds = array<i64: 256, 32>}, {transform_indices = @transform_2, window_bounds = array<i64: 1, 32>}, {transform_indices = @transform_3, window_bounds = array<i64: 16, 32>}, {transform_indices = @transform_4, window_bounds = array<i64: 16, 32>}]} {
    %c0_i32 = arith.constant 0 : i32
    %0 = arith.cmpi eq, %arg2, %c0_i32 : i32
    %1 = arith.extui %0 : i1 to i32
    %c0_i32_0 = arith.constant 0 : i32
    %2 = arith.cmpi ne, %1, %c0_i32_0 : i32
    scf.if %2 {
      %cst_10 = arith.constant 0.000000e+00 : f32
      %13 = vector.broadcast %cst_10 : f32 to vector<16x32xf32>
      %c0_11 = arith.constant 0 : index
      %c0_12 = arith.constant 0 : index
      %14 = vector.load %arg8[%c0_11, %c0_12] : memref<16x32xf32, #tpu.memory_space<vmem>>, vector<16x32xf32>
      tpu.vector_store %arg8[%c0_11, %c0_12], %13 {strides = array<i32>} : memref<16x32xf32, #tpu.memory_space<vmem>>, vector<16x32xf32>,
    } else {
    }
    %c0 = arith.constant 0 : index
    %c0_1 = arith.constant 0 : index
    %3 = vector.load %arg8[%c0, %c0_1] : memref<16x32xf32, #tpu.memory_space<vmem>>, vector<16x32xf32>
    %c0_2 = arith.constant 0 : index
    %c0_3 = arith.constant 0 : index
    %4 = vector.load %arg3[%c0_2, %c0_3] : memref<16x256xf32, #tpu.memory_space<vmem>>, vector<16x256xf32>
    %5 = arith.truncf %4 : vector<16x256xf32> to vector<16x256xbf16>
    %c0_4 = arith.constant 0 : index
    %c0_5 = arith.constant 0 : index
    %6 = vector.load %arg4[%c0_4, %c0_5] : memref<256x32xbf16, #tpu.memory_space<vmem>>, vector<256x32xbf16>
    %cst = arith.constant dense<0.000000e+00> : vector<16x32xf32>
    %7 = tpu.matmul %5, %6, %cst {dimension_numbers = #tpu.dot_dimension_numbers<[1], [0], [0], [1], [0, 0, 1, 1], [], []>} : vector<16x256xbf16>, vector<256x32xbf16>, vector<16x32xf32> -> vector<16x32xf32>
    %8 = arith.addf %3, %7 : vector<16x32xf32>
    %c0_6 = arith.constant 0 : index
    %c0_7 = arith.constant 0 : index
    %9 = vector.load %arg8[%c0_6, %c0_7] : memref<16x32xf32, #tpu.memory_space<vmem>>, vector<16x32xf32>
    tpu.vector_store %arg8[%c0_6, %c0_7], %8 {strides = array<i32>} : memref<16x32xf32, #tpu.memory_space<vmem>>, vector<16x32xf32>,
    %c0_i32_8 = arith.constant 0 : i32
    %10 = arith.cmpi eq, %arg2, %c0_i32_8 : i32
    %11 = arith.extui %10 : i1 to i32
    %c0_i32_9 = arith.constant 0 : i32
    %12 = arith.cmpi ne, %11, %c0_i32_9 : i32
    scf.if %12 {
      %c0_10 = arith.constant 0 : index
      %c0_11 = arith.constant 0 : index
      %13 = vector.load %arg8[%c0_10, %c0_11] : memref<16x32xf32, #tpu.memory_space<vmem>>, vector<16x32xf32>
      %c0_12 = arith.constant 0 : index
      %c0_13 = arith.constant 0 : index
      %14 = vector.load %arg5[%c0_12, %c0_13] : memref<1x32xf32, #tpu.memory_space<vmem>>, vector<1x32xf32>
      %15 = vector.broadcast %14 : vector<1x32xf32> to vector<16x32xf32>
      %16 = arith.addf %13, %15 : vector<16x32xf32>
      %c0_14 = arith.constant 0 : index
      %c0_15 = arith.constant 0 : index
      %17 = vector.load %arg6[%c0_14, %c0_15] : memref<16x32xf32, #tpu.memory_space<vmem>>, vector<16x32xf32>
      %18 = arith.addf %16, %17 : vector<16x32xf32>
      %c0_16 = arith.constant 0 : index
      %c0_17 = arith.constant 0 : index
      %19 = vector.load %arg7[%c0_16, %c0_17] : memref<16x32xf32, #tpu.memory_space<vmem>>, vector<16x32xf32>
      tpu.vector_store %arg7[%c0_16, %c0_17], %18 {strides = array<i32>} : memref<16x32xf32, #tpu.memory_space<vmem>>, vector<16x32xf32>,
    } else {
    }
    return
  }
  func.func @transform_0(%arg0: i32, %arg1: i32, %arg2: i32) -> (i32, i32) {
    %c0_i32 = arith.constant 0 : i32
    return %arg0, %arg2 : i32, i32
  }
  func.func @transform_1(%arg0: i32, %arg1: i32, %arg2: i32) -> (i32, i32) {
    %c0_i32 = arith.constant 0 : i32
    return %arg2, %arg1 : i32, i32
  }
  func.func @transform_2(%arg0: i32, %arg1: i32, %arg2: i32) -> (i32, i32) {
    %c0_i32 = arith.constant 0 : i32
    %c0_i32_0 = arith.constant 0 : i32
    return %c0_i32, %arg1 : i32, i32
  }
  func.func @transform_3(%arg0: i32, %arg1: i32, %arg2: i32) -> (i32, i32) {
    %c0_i32 = arith.constant 0 : i32
    return %arg0, %arg1 : i32, i32
  }
  func.func @transform_4(%arg0: i32, %arg1: i32, %arg2: i32) -> (i32, i32) {
    %c0_i32 = arith.constant 0 : i32
    return %arg0, %arg1 : i32, i32
  }
}

module attributes {stable_mosaic.version = 11 : i64} {
  func.func @_mha_kernel(%arg0: i32, %arg1: memref<1x8x32xf32, #tpu.memory_space<vmem>>, %arg2: memref<1x8x32xf32, #tpu.memory_space<vmem>>, %arg3: memref<4x32x8xbf16, #tpu.memory_space<vmem>>, %arg4: memref<4x32x8xbf16, #tpu.memory_space<vmem>>, %arg5: memref<4x32x8xbf16, #tpu.memory_space<vmem>>, %arg6: memref<4x1x8xf32, #tpu.memory_space<vmem>>, %arg7: memref<4x1x8xf32, #tpu.memory_space<vmem>>, %arg8: memref<4x1x8xf32, #tpu.memory_space<vmem>>, %arg9: memref<4x8x32xbf16, #tpu.memory_space<vmem>>, %arg10: memref<1x32xf32, #tpu.memory_space<vmem>>, %arg11: memref<1x32xf32, #tpu.memory_space<vmem>>, %arg12: memref<1x32xf32, #tpu.memory_space<vmem>>, %arg13: memref<1x8x32xf32, #tpu.memory_space<vmem>>) attributes {dimension_semantics = [#tpu.dimension_semantics<parallel>], iteration_bounds = array<i64: 2>, scalar_prefetch = 0 : i64, scratch_operands = 0 : i64, tpu.core_type = #tpu.core_type<tc>, window_params = [{transform_indices = @transform_0, window_bounds = array<i64: 1, 8, 32>}, {transform_indices = @transform_1, window_bounds = array<i64: 1, 8, 32>}, {pipeline_mode = #tpu.pipeline_mode<synchronous>, transform_indices = @transform_2, window_bounds = array<i64: 4, 32, 8>}, {pipeline_mode = #tpu.pipeline_mode<synchronous>, transform_indices = @transform_3, window_bounds = array<i64: 4, 32, 8>}, {pipeline_mode = #tpu.pipeline_mode<synchronous>, transform_indices = @transform_4, window_bounds = array<i64: 4, 32, 8>}, {pipeline_mode = #tpu.pipeline_mode<synchronous>, transform_indices = @transform_5, window_bounds = array<i64: 4, 1, 8>}, {pipeline_mode = #tpu.pipeline_mode<synchronous>, transform_indices = @transform_6, window_bounds = array<i64: 4, 1, 8>}, {pipeline_mode = #tpu.pipeline_mode<synchronous>, transform_indices = @transform_7, window_bounds = array<i64: 4, 1, 8>}, {pipeline_mode = #tpu.pipeline_mode<synchronous>, transform_indices = @transform_8, window_bounds = array<i64: 4, 8, 32>}, {pipeline_mode = #tpu.pipeline_mode<synchronous>, transform_indices = @transform_9, window_bounds = array<i64: 1, 32>}, {pipeline_mode = #tpu.pipeline_mode<synchronous>, transform_indices = @transform_10, window_bounds = array<i64: 1, 32>}, {pipeline_mode = #tpu.pipeline_mode<synchronous>, transform_indices = @transform_11, window_bounds = array<i64: 1, 32>}, {transform_indices = @transform_12, window_bounds = array<i64: 1, 8, 32>}]} {
    %c0 = arith.constant 0 : index
    %c0_0 = arith.constant 0 : index
    %c0_1 = arith.constant 0 : index
    %0 = vector.load %arg1[%c0, %c0_0, %c0_1] : memref<1x8x32xf32, #tpu.memory_space<vmem>>, vector<1x8x32xf32>
    %1 = vector.shape_cast %0 : vector<1x8x32xf32> to vector<8x32xf32>
    %c0_2 = arith.constant 0 : index
    %c0_3 = arith.constant 0 : index
    %c0_4 = arith.constant 0 : index
    %2 = vector.load %arg2[%c0_2, %c0_3, %c0_4] : memref<1x8x32xf32, #tpu.memory_space<vmem>>, vector<1x8x32xf32>
    %3 = vector.shape_cast %2 : vector<1x8x32xf32> to vector<8x32xf32>
    %4 = arith.truncf %1 : vector<8x32xf32> to vector<8x32xbf16>
    %5 = arith.truncf %3 : vector<8x32xf32> to vector<8x32xbf16>
    %c0_5 = arith.constant 0 : index
    %c0_6 = arith.constant 0 : index
    %c0_7 = arith.constant 0 : index
    %6 = vector.load %arg3[%c0_5, %c0_6, %c0_7] : memref<4x32x8xbf16, #tpu.memory_space<vmem>>, vector<1x32x8xbf16>
    %7 = vector.shape_cast %6 : vector<1x32x8xbf16> to vector<32x8xbf16>
    %cst = arith.constant dense<0.000000e+00> : vector<8x8xf32>
    %8 = tpu.matmul %4, %7, %cst {dimension_numbers = #tpu.dot_dimension_numbers<[1], [0], [0], [1], [0, 0, 1, 1], [], []>} : vector<8x32xbf16>, vector<32x8xbf16>, vector<8x8xf32> -> vector<8x8xf32>
    %c0_8 = arith.constant 0 : index
    %c0_9 = arith.constant 0 : index
    %c0_10 = arith.constant 0 : index
    %9 = vector.load %arg6[%c0_8, %c0_9, %c0_10] : memref<4x1x8xf32, #tpu.memory_space<vmem>>, vector<1x1x8xf32>
    %10 = vector.shape_cast %9 : vector<1x1x8xf32> to vector<1x8xf32>
    %11 = vector.broadcast %10 : vector<1x8xf32> to vector<8x8xf32>
    %12 = arith.addf %8, %11 : vector<8x8xf32>
    %c0_11 = arith.constant 0 : index
    %c0_12 = arith.constant 0 : index
    %c0_13 = arith.constant 0 : index
    %13 = vector.load %arg4[%c0_11, %c0_12, %c0_13] : memref<4x32x8xbf16, #tpu.memory_space<vmem>>, vector<1x32x8xbf16>
    %14 = vector.shape_cast %13 : vector<1x32x8xbf16> to vector<32x8xbf16>
    %cst_14 = arith.constant dense<0.000000e+00> : vector<8x8xf32>
    %15 = tpu.matmul %5, %14, %cst_14 {dimension_numbers = #tpu.dot_dimension_numbers<[1], [0], [0], [1], [0, 0, 1, 1], [], []>} : vector<8x32xbf16>, vector<32x8xbf16>, vector<8x8xf32> -> vector<8x8xf32>
    %c0_15 = arith.constant 0 : index
    %c0_16 = arith.constant 0 : index
    %c0_17 = arith.constant 0 : index
    %16 = vector.load %arg7[%c0_15, %c0_16, %c0_17] : memref<4x1x8xf32, #tpu.memory_space<vmem>>, vector<1x1x8xf32>
    %17 = vector.shape_cast %16 : vector<1x1x8xf32> to vector<1x8xf32>
    %18 = vector.broadcast %17 : vector<1x8xf32> to vector<8x8xf32>
    %19 = arith.addf %15, %18 : vector<8x8xf32>
    %c0_18 = arith.constant 0 : index
    %c0_19 = arith.constant 0 : index
    %c0_20 = arith.constant 0 : index
    %20 = vector.load %arg5[%c0_18, %c0_19, %c0_20] : memref<4x32x8xbf16, #tpu.memory_space<vmem>>, vector<1x32x8xbf16>
    %21 = vector.shape_cast %20 : vector<1x32x8xbf16> to vector<32x8xbf16>
    %cst_21 = arith.constant dense<0.000000e+00> : vector<8x8xf32>
    %22 = tpu.matmul %5, %21, %cst_21 {dimension_numbers = #tpu.dot_dimension_numbers<[1], [0], [0], [1], [0, 0, 1, 1], [], []>} : vector<8x32xbf16>, vector<32x8xbf16>, vector<8x8xf32> -> vector<8x8xf32>
    %c0_22 = arith.constant 0 : index
    %c0_23 = arith.constant 0 : index
    %c0_24 = arith.constant 0 : index
    %23 = vector.load %arg8[%c0_22, %c0_23, %c0_24] : memref<4x1x8xf32, #tpu.memory_space<vmem>>, vector<1x1x8xf32>
    %24 = vector.shape_cast %23 : vector<1x1x8xf32> to vector<1x8xf32>
    %25 = vector.broadcast %24 : vector<1x8xf32> to vector<8x8xf32>
    %26 = arith.addf %22, %25 : vector<8x8xf32>
    %27 = arith.truncf %12 : vector<8x8xf32> to vector<8x8xbf16>
    %28 = arith.truncf %19 : vector<8x8xf32> to vector<8x8xbf16>
    %cst_25 = arith.constant dense<0.000000e+00> : vector<8x8xf32>
    %29 = tpu.matmul %27, %28, %cst_25 {dimension_numbers = #tpu.dot_dimension_numbers<[1], [1], [0], [0], [0, 0, 1, 0], [], []>} : vector<8x8xbf16>, vector<8x8xbf16>, vector<8x8xf32> -> vector<8x8xf32>
    %cst_26 = arith.constant 0.353553385 : f32
    %30 = vector.broadcast %cst_26 : f32 to vector<8x8xf32>
    %31 = arith.mulf %29, %30 : vector<8x8xf32>
    %cst_27 = arith.constant dense<0xFF800000> : vector<8xf32>
    %32 = vector.multi_reduction <maximumf>, %31, %cst_27 [1] : vector<8x8xf32> to vector<8xf32>
    %33 = vector.shape_cast %32 : vector<8xf32> to vector<8x1xf32>
    %34 = vector.broadcast %33 : vector<8x1xf32> to vector<8x8xf32>
    %35 = arith.subf %31, %34 : vector<8x8xf32>
    %36 = math.exp %35 : vector<8x8xf32>
    %cst_28 = arith.constant dense<0.000000e+00> : vector<8xf32>
    %37 = vector.multi_reduction <add>, %36, %cst_28 [1] : vector<8x8xf32> to vector<8xf32>
    %38 = vector.shape_cast %37 : vector<8xf32> to vector<8x1xf32>
    %39 = tpu.reciprocal %38 {approx = true} : vector<8x1xf32> -> vector<8x1xf32>
    %40 = vector.broadcast %39 : vector<8x1xf32> to vector<8x8xf32>
    %41 = arith.mulf %36, %40 : vector<8x8xf32>
    %42 = arith.truncf %41 : vector<8x8xf32> to vector<8x8xbf16>
    %43 = arith.truncf %26 : vector<8x8xf32> to vector<8x8xbf16>
    %cst_29 = arith.constant dense<0.000000e+00> : vector<8x8xf32>
    %44 = tpu.matmul %42, %43, %cst_29 {dimension_numbers = #tpu.dot_dimension_numbers<[1], [0], [0], [1], [0, 0, 1, 1], [], []>} : vector<8x8xbf16>, vector<8x8xbf16>, vector<8x8xf32> -> vector<8x8xf32>
    %45 = arith.truncf %44 : vector<8x8xf32> to vector<8x8xbf16>
    %c0_30 = arith.constant 0 : index
    %c0_31 = arith.constant 0 : index
    %c0_32 = arith.constant 0 : index
    %46 = vector.load %arg9[%c0_30, %c0_31, %c0_32] : memref<4x8x32xbf16, #tpu.memory_space<vmem>>, vector<1x8x32xbf16>
    %47 = vector.shape_cast %46 : vector<1x8x32xbf16> to vector<8x32xbf16>
    %cst_33 = arith.constant dense<0.000000e+00> : vector<8x32xf32>
    %48 = tpu.matmul %45, %47, %cst_33 {dimension_numbers = #tpu.dot_dimension_numbers<[1], [0], [0], [1], [0, 0, 1, 1], [], []>} : vector<8x8xbf16>, vector<8x32xbf16>, vector<8x32xf32> -> vector<8x32xf32>
    %c1 = arith.constant 1 : index
    %c0_34 = arith.constant 0 : index
    %c0_35 = arith.constant 0 : index
    %49 = vector.load %arg3[%c1, %c0_34, %c0_35] : memref<4x32x8xbf16, #tpu.memory_space<vmem>>, vector<1x32x8xbf16>
    %50 = vector.shape_cast %49 : vector<1x32x8xbf16> to vector<32x8xbf16>
    %cst_36 = arith.constant dense<0.000000e+00> : vector<8x8xf32>
    %51 = tpu.matmul %4, %50, %cst_36 {dimension_numbers = #tpu.dot_dimension_numbers<[1], [0], [0], [1], [0, 0, 1, 1], [], []>} : vector<8x32xbf16>, vector<32x8xbf16>, vector<8x8xf32> -> vector<8x8xf32>
    %c1_37 = arith.constant 1 : index
    %c0_38 = arith.constant 0 : index
    %c0_39 = arith.constant 0 : index
    %52 = vector.load %arg6[%c1_37, %c0_38, %c0_39] : memref<4x1x8xf32, #tpu.memory_space<vmem>>, vector<1x1x8xf32>
    %53 = vector.shape_cast %52 : vector<1x1x8xf32> to vector<1x8xf32>
    %54 = vector.broadcast %53 : vector<1x8xf32> to vector<8x8xf32>
    %55 = arith.addf %51, %54 : vector<8x8xf32>
    %c1_40 = arith.constant 1 : index
    %c0_41 = arith.constant 0 : index
    %c0_42 = arith.constant 0 : index
    %56 = vector.load %arg4[%c1_40, %c0_41, %c0_42] : memref<4x32x8xbf16, #tpu.memory_space<vmem>>, vector<1x32x8xbf16>
    %57 = vector.shape_cast %56 : vector<1x32x8xbf16> to vector<32x8xbf16>
    %cst_43 = arith.constant dense<0.000000e+00> : vector<8x8xf32>
    %58 = tpu.matmul %5, %57, %cst_43 {dimension_numbers = #tpu.dot_dimension_numbers<[1], [0], [0], [1], [0, 0, 1, 1], [], []>} : vector<8x32xbf16>, vector<32x8xbf16>, vector<8x8xf32> -> vector<8x8xf32>
    %c1_44 = arith.constant 1 : index
    %c0_45 = arith.constant 0 : index
    %c0_46 = arith.constant 0 : index
    %59 = vector.load %arg7[%c1_44, %c0_45, %c0_46] : memref<4x1x8xf32, #tpu.memory_space<vmem>>, vector<1x1x8xf32>
    %60 = vector.shape_cast %59 : vector<1x1x8xf32> to vector<1x8xf32>
    %61 = vector.broadcast %60 : vector<1x8xf32> to vector<8x8xf32>
    %62 = arith.addf %58, %61 : vector<8x8xf32>
    %c1_47 = arith.constant 1 : index
    %c0_48 = arith.constant 0 : index
    %c0_49 = arith.constant 0 : index
    %63 = vector.load %arg5[%c1_47, %c0_48, %c0_49] : memref<4x32x8xbf16, #tpu.memory_space<vmem>>, vector<1x32x8xbf16>
    %64 = vector.shape_cast %63 : vector<1x32x8xbf16> to vector<32x8xbf16>
    %cst_50 = arith.constant dense<0.000000e+00> : vector<8x8xf32>
    %65 = tpu.matmul %5, %64, %cst_50 {dimension_numbers = #tpu.dot_dimension_numbers<[1], [0], [0], [1], [0, 0, 1, 1], [], []>} : vector<8x32xbf16>, vector<32x8xbf16>, vector<8x8xf32> -> vector<8x8xf32>
    %c1_51 = arith.constant 1 : index
    %c0_52 = arith.constant 0 : index
    %c0_53 = arith.constant 0 : index
    %66 = vector.load %arg8[%c1_51, %c0_52, %c0_53] : memref<4x1x8xf32, #tpu.memory_space<vmem>>, vector<1x1x8xf32>
    %67 = vector.shape_cast %66 : vector<1x1x8xf32> to vector<1x8xf32>
    %68 = vector.broadcast %67 : vector<1x8xf32> to vector<8x8xf32>
    %69 = arith.addf %65, %68 : vector<8x8xf32>
    %70 = arith.truncf %55 : vector<8x8xf32> to vector<8x8xbf16>
    %71 = arith.truncf %62 : vector<8x8xf32> to vector<8x8xbf16>
    %cst_54 = arith.constant dense<0.000000e+00> : vector<8x8xf32>
    %72 = tpu.matmul %70, %71, %cst_54 {dimension_numbers = #tpu.dot_dimension_numbers<[1], [1], [0], [0], [0, 0, 1, 0], [], []>} : vector<8x8xbf16>, vector<8x8xbf16>, vector<8x8xf32> -> vector<8x8xf32>
    %cst_55 = arith.constant 0.353553385 : f32
    %73 = vector.broadcast %cst_55 : f32 to vector<8x8xf32>
    %74 = arith.mulf %72, %73 : vector<8x8xf32>
    %cst_56 = arith.constant dense<0xFF800000> : vector<8xf32>
    %75 = vector.multi_reduction <maximumf>, %74, %cst_56 [1] : vector<8x8xf32> to vector<8xf32>
    %76 = vector.shape_cast %75 : vector<8xf32> to vector<8x1xf32>
    %77 = vector.broadcast %76 : vector<8x1xf32> to vector<8x8xf32>
    %78 = arith.subf %74, %77 : vector<8x8xf32>
    %79 = math.exp %78 : vector<8x8xf32>
    %cst_57 = arith.constant dense<0.000000e+00> : vector<8xf32>
    %80 = vector.multi_reduction <add>, %79, %cst_57 [1] : vector<8x8xf32> to vector<8xf32>
    %81 = vector.shape_cast %80 : vector<8xf32> to vector<8x1xf32>
    %82 = tpu.reciprocal %81 {approx = true} : vector<8x1xf32> -> vector<8x1xf32>
    %83 = vector.broadcast %82 : vector<8x1xf32> to vector<8x8xf32>
    %84 = arith.mulf %79, %83 : vector<8x8xf32>
    %85 = arith.truncf %84 : vector<8x8xf32> to vector<8x8xbf16>
    %86 = arith.truncf %69 : vector<8x8xf32> to vector<8x8xbf16>
    %cst_58 = arith.constant dense<0.000000e+00> : vector<8x8xf32>
    %87 = tpu.matmul %85, %86, %cst_58 {dimension_numbers = #tpu.dot_dimension_numbers<[1], [0], [0], [1], [0, 0, 1, 1], [], []>} : vector<8x8xbf16>, vector<8x8xbf16>, vector<8x8xf32> -> vector<8x8xf32>
    %88 = arith.truncf %87 : vector<8x8xf32> to vector<8x8xbf16>
    %c1_59 = arith.constant 1 : index
    %c0_60 = arith.constant 0 : index
    %c0_61 = arith.constant 0 : index
    %89 = vector.load %arg9[%c1_59, %c0_60, %c0_61] : memref<4x8x32xbf16, #tpu.memory_space<vmem>>, vector<1x8x32xbf16>
    %90 = vector.shape_cast %89 : vector<1x8x32xbf16> to vector<8x32xbf16>
    %cst_62 = arith.constant dense<0.000000e+00> : vector<8x32xf32>
    %91 = tpu.matmul %88, %90, %cst_62 {dimension_numbers = #tpu.dot_dimension_numbers<[1], [0], [0], [1], [0, 0, 1, 1], [], []>} : vector<8x8xbf16>, vector<8x32xbf16>, vector<8x32xf32> -> vector<8x32xf32>
    %92 = arith.addf %48, %91 : vector<8x32xf32>
    %c2 = arith.constant 2 : index
    %c0_63 = arith.constant 0 : index
    %c0_64 = arith.constant 0 : index
    %93 = vector.load %arg3[%c2, %c0_63, %c0_64] : memref<4x32x8xbf16, #tpu.memory_space<vmem>>, vector<1x32x8xbf16>
    %94 = vector.shape_cast %93 : vector<1x32x8xbf16> to vector<32x8xbf16>
    %cst_65 = arith.constant dense<0.000000e+00> : vector<8x8xf32>
    %95 = tpu.matmul %4, %94, %cst_65 {dimension_numbers = #tpu.dot_dimension_numbers<[1], [0], [0], [1], [0, 0, 1, 1], [], []>} : vector<8x32xbf16>, vector<32x8xbf16>, vector<8x8xf32> -> vector<8x8xf32>
    %c2_66 = arith.constant 2 : index
    %c0_67 = arith.constant 0 : index
    %c0_68 = arith.constant 0 : index
    %96 = vector.load %arg6[%c2_66, %c0_67, %c0_68] : memref<4x1x8xf32, #tpu.memory_space<vmem>>, vector<1x1x8xf32>
    %97 = vector.shape_cast %96 : vector<1x1x8xf32> to vector<1x8xf32>
    %98 = vector.broadcast %97 : vector<1x8xf32> to vector<8x8xf32>
    %99 = arith.addf %95, %98 : vector<8x8xf32>
    %c2_69 = arith.constant 2 : index
    %c0_70 = arith.constant 0 : index
    %c0_71 = arith.constant 0 : index
    %100 = vector.load %arg4[%c2_69, %c0_70, %c0_71] : memref<4x32x8xbf16, #tpu.memory_space<vmem>>, vector<1x32x8xbf16>
    %101 = vector.shape_cast %100 : vector<1x32x8xbf16> to vector<32x8xbf16>
    %cst_72 = arith.constant dense<0.000000e+00> : vector<8x8xf32>
    %102 = tpu.matmul %5, %101, %cst_72 {dimension_numbers = #tpu.dot_dimension_numbers<[1], [0], [0], [1], [0, 0, 1, 1], [], []>} : vector<8x32xbf16>, vector<32x8xbf16>, vector<8x8xf32> -> vector<8x8xf32>
    %c2_73 = arith.constant 2 : index
    %c0_74 = arith.constant 0 : index
    %c0_75 = arith.constant 0 : index
    %103 = vector.load %arg7[%c2_73, %c0_74, %c0_75] : memref<4x1x8xf32, #tpu.memory_space<vmem>>, vector<1x1x8xf32>
    %104 = vector.shape_cast %103 : vector<1x1x8xf32> to vector<1x8xf32>
    %105 = vector.broadcast %104 : vector<1x8xf32> to vector<8x8xf32>
    %106 = arith.addf %102, %105 : vector<8x8xf32>
    %c2_76 = arith.constant 2 : index
    %c0_77 = arith.constant 0 : index
    %c0_78 = arith.constant 0 : index
    %107 = vector.load %arg5[%c2_76, %c0_77, %c0_78] : memref<4x32x8xbf16, #tpu.memory_space<vmem>>, vector<1x32x8xbf16>
    %108 = vector.shape_cast %107 : vector<1x32x8xbf16> to vector<32x8xbf16>
    %cst_79 = arith.constant dense<0.000000e+00> : vector<8x8xf32>
    %109 = tpu.matmul %5, %108, %cst_79 {dimension_numbers = #tpu.dot_dimension_numbers<[1], [0], [0], [1], [0, 0, 1, 1], [], []>} : vector<8x32xbf16>, vector<32x8xbf16>, vector<8x8xf32> -> vector<8x8xf32>
    %c2_80 = arith.constant 2 : index
    %c0_81 = arith.constant 0 : index
    %c0_82 = arith.constant 0 : index
    %110 = vector.load %arg8[%c2_80, %c0_81, %c0_82] : memref<4x1x8xf32, #tpu.memory_space<vmem>>, vector<1x1x8xf32>
    %111 = vector.shape_cast %110 : vector<1x1x8xf32> to vector<1x8xf32>
    %112 = vector.broadcast %111 : vector<1x8xf32> to vector<8x8xf32>
    %113 = arith.addf %109, %112 : vector<8x8xf32>
    %114 = arith.truncf %99 : vector<8x8xf32> to vector<8x8xbf16>
    %115 = arith.truncf %106 : vector<8x8xf32> to vector<8x8xbf16>
    %cst_83 = arith.constant dense<0.000000e+00> : vector<8x8xf32>
    %116 = tpu.matmul %114, %115, %cst_83 {dimension_numbers = #tpu.dot_dimension_numbers<[1], [1], [0], [0], [0, 0, 1, 0], [], []>} : vector<8x8xbf16>, vector<8x8xbf16>, vector<8x8xf32> -> vector<8x8xf32>
    %cst_84 = arith.constant 0.353553385 : f32
    %117 = vector.broadcast %cst_84 : f32 to vector<8x8xf32>
    %118 = arith.mulf %116, %117 : vector<8x8xf32>
    %cst_85 = arith.constant dense<0xFF800000> : vector<8xf32>
    %119 = vector.multi_reduction <maximumf>, %118, %cst_85 [1] : vector<8x8xf32> to vector<8xf32>
    %120 = vector.shape_cast %119 : vector<8xf32> to vector<8x1xf32>
    %121 = vector.broadcast %120 : vector<8x1xf32> to vector<8x8xf32>
    %122 = arith.subf %118, %121 : vector<8x8xf32>
    %123 = math.exp %122 : vector<8x8xf32>
    %cst_86 = arith.constant dense<0.000000e+00> : vector<8xf32>
    %124 = vector.multi_reduction <add>, %123, %cst_86 [1] : vector<8x8xf32> to vector<8xf32>
    %125 = vector.shape_cast %124 : vector<8xf32> to vector<8x1xf32>
    %126 = tpu.reciprocal %125 {approx = true} : vector<8x1xf32> -> vector<8x1xf32>
    %127 = vector.broadcast %126 : vector<8x1xf32> to vector<8x8xf32>
    %128 = arith.mulf %123, %127 : vector<8x8xf32>
    %129 = arith.truncf %128 : vector<8x8xf32> to vector<8x8xbf16>
    %130 = arith.truncf %113 : vector<8x8xf32> to vector<8x8xbf16>
    %cst_87 = arith.constant dense<0.000000e+00> : vector<8x8xf32>
    %131 = tpu.matmul %129, %130, %cst_87 {dimension_numbers = #tpu.dot_dimension_numbers<[1], [0], [0], [1], [0, 0, 1, 1], [], []>} : vector<8x8xbf16>, vector<8x8xbf16>, vector<8x8xf32> -> vector<8x8xf32>
    %132 = arith.truncf %131 : vector<8x8xf32> to vector<8x8xbf16>
    %c2_88 = arith.constant 2 : index
    %c0_89 = arith.constant 0 : index
    %c0_90 = arith.constant 0 : index
    %133 = vector.load %arg9[%c2_88, %c0_89, %c0_90] : memref<4x8x32xbf16, #tpu.memory_space<vmem>>, vector<1x8x32xbf16>
    %134 = vector.shape_cast %133 : vector<1x8x32xbf16> to vector<8x32xbf16>
    %cst_91 = arith.constant dense<0.000000e+00> : vector<8x32xf32>
    %135 = tpu.matmul %132, %134, %cst_91 {dimension_numbers = #tpu.dot_dimension_numbers<[1], [0], [0], [1], [0, 0, 1, 1], [], []>} : vector<8x8xbf16>, vector<8x32xbf16>, vector<8x32xf32> -> vector<8x32xf32>
    %136 = arith.addf %92, %135 : vector<8x32xf32>
    %c3 = arith.constant 3 : index
    %c0_92 = arith.constant 0 : index
    %c0_93 = arith.constant 0 : index
    %137 = vector.load %arg3[%c3, %c0_92, %c0_93] : memref<4x32x8xbf16, #tpu.memory_space<vmem>>, vector<1x32x8xbf16>
    %138 = vector.shape_cast %137 : vector<1x32x8xbf16> to vector<32x8xbf16>
    %cst_94 = arith.constant dense<0.000000e+00> : vector<8x8xf32>
    %139 = tpu.matmul %4, %138, %cst_94 {dimension_numbers = #tpu.dot_dimension_numbers<[1], [0], [0], [1], [0, 0, 1, 1], [], []>} : vector<8x32xbf16>, vector<32x8xbf16>, vector<8x8xf32> -> vector<8x8xf32>
    %c3_95 = arith.constant 3 : index
    %c0_96 = arith.constant 0 : index
    %c0_97 = arith.constant 0 : index
    %140 = vector.load %arg6[%c3_95, %c0_96, %c0_97] : memref<4x1x8xf32, #tpu.memory_space<vmem>>, vector<1x1x8xf32>
    %141 = vector.shape_cast %140 : vector<1x1x8xf32> to vector<1x8xf32>
    %142 = vector.broadcast %141 : vector<1x8xf32> to vector<8x8xf32>
    %143 = arith.addf %139, %142 : vector<8x8xf32>
    %c3_98 = arith.constant 3 : index
    %c0_99 = arith.constant 0 : index
    %c0_100 = arith.constant 0 : index
    %144 = vector.load %arg4[%c3_98, %c0_99, %c0_100] : memref<4x32x8xbf16, #tpu.memory_space<vmem>>, vector<1x32x8xbf16>
    %145 = vector.shape_cast %144 : vector<1x32x8xbf16> to vector<32x8xbf16>
    %cst_101 = arith.constant dense<0.000000e+00> : vector<8x8xf32>
    %146 = tpu.matmul %5, %145, %cst_101 {dimension_numbers = #tpu.dot_dimension_numbers<[1], [0], [0], [1], [0, 0, 1, 1], [], []>} : vector<8x32xbf16>, vector<32x8xbf16>, vector<8x8xf32> -> vector<8x8xf32>
    %c3_102 = arith.constant 3 : index
    %c0_103 = arith.constant 0 : index
    %c0_104 = arith.constant 0 : index
    %147 = vector.load %arg7[%c3_102, %c0_103, %c0_104] : memref<4x1x8xf32, #tpu.memory_space<vmem>>, vector<1x1x8xf32>
    %148 = vector.shape_cast %147 : vector<1x1x8xf32> to vector<1x8xf32>
    %149 = vector.broadcast %148 : vector<1x8xf32> to vector<8x8xf32>
    %150 = arith.addf %146, %149 : vector<8x8xf32>
    %c3_105 = arith.constant 3 : index
    %c0_106 = arith.constant 0 : index
    %c0_107 = arith.constant 0 : index
    %151 = vector.load %arg5[%c3_105, %c0_106, %c0_107] : memref<4x32x8xbf16, #tpu.memory_space<vmem>>, vector<1x32x8xbf16>
    %152 = vector.shape_cast %151 : vector<1x32x8xbf16> to vector<32x8xbf16>
    %cst_108 = arith.constant dense<0.000000e+00> : vector<8x8xf32>
    %153 = tpu.matmul %5, %152, %cst_108 {dimension_numbers = #tpu.dot_dimension_numbers<[1], [0], [0], [1], [0, 0, 1, 1], [], []>} : vector<8x32xbf16>, vector<32x8xbf16>, vector<8x8xf32> -> vector<8x8xf32>
    %c3_109 = arith.constant 3 : index
    %c0_110 = arith.constant 0 : index
    %c0_111 = arith.constant 0 : index
    %154 = vector.load %arg8[%c3_109, %c0_110, %c0_111] : memref<4x1x8xf32, #tpu.memory_space<vmem>>, vector<1x1x8xf32>
    %155 = vector.shape_cast %154 : vector<1x1x8xf32> to vector<1x8xf32>
    %156 = vector.broadcast %155 : vector<1x8xf32> to vector<8x8xf32>
    %157 = arith.addf %153, %156 : vector<8x8xf32>
    %158 = arith.truncf %143 : vector<8x8xf32> to vector<8x8xbf16>
    %159 = arith.truncf %150 : vector<8x8xf32> to vector<8x8xbf16>
    %cst_112 = arith.constant dense<0.000000e+00> : vector<8x8xf32>
    %160 = tpu.matmul %158, %159, %cst_112 {dimension_numbers = #tpu.dot_dimension_numbers<[1], [1], [0], [0], [0, 0, 1, 0], [], []>} : vector<8x8xbf16>, vector<8x8xbf16>, vector<8x8xf32> -> vector<8x8xf32>
    %cst_113 = arith.constant 0.353553385 : f32
    %161 = vector.broadcast %cst_113 : f32 to vector<8x8xf32>
    %162 = arith.mulf %160, %161 : vector<8x8xf32>
    %cst_114 = arith.constant dense<0xFF800000> : vector<8xf32>
    %163 = vector.multi_reduction <maximumf>, %162, %cst_114 [1] : vector<8x8xf32> to vector<8xf32>
    %164 = vector.shape_cast %163 : vector<8xf32> to vector<8x1xf32>
    %165 = vector.broadcast %164 : vector<8x1xf32> to vector<8x8xf32>
    %166 = arith.subf %162, %165 : vector<8x8xf32>
    %167 = math.exp %166 : vector<8x8xf32>
    %cst_115 = arith.constant dense<0.000000e+00> : vector<8xf32>
    %168 = vector.multi_reduction <add>, %167, %cst_115 [1] : vector<8x8xf32> to vector<8xf32>
    %169 = vector.shape_cast %168 : vector<8xf32> to vector<8x1xf32>
    %170 = tpu.reciprocal %169 {approx = true} : vector<8x1xf32> -> vector<8x1xf32>
    %171 = vector.broadcast %170 : vector<8x1xf32> to vector<8x8xf32>
    %172 = arith.mulf %167, %171 : vector<8x8xf32>
    %173 = arith.truncf %172 : vector<8x8xf32> to vector<8x8xbf16>
    %174 = arith.truncf %157 : vector<8x8xf32> to vector<8x8xbf16>
    %cst_116 = arith.constant dense<0.000000e+00> : vector<8x8xf32>
    %175 = tpu.matmul %173, %174, %cst_116 {dimension_numbers = #tpu.dot_dimension_numbers<[1], [0], [0], [1], [0, 0, 1, 1], [], []>} : vector<8x8xbf16>, vector<8x8xbf16>, vector<8x8xf32> -> vector<8x8xf32>
    %176 = arith.truncf %175 : vector<8x8xf32> to vector<8x8xbf16>
    %c3_117 = arith.constant 3 : index
    %c0_118 = arith.constant 0 : index
    %c0_119 = arith.constant 0 : index
    %177 = vector.load %arg9[%c3_117, %c0_118, %c0_119] : memref<4x8x32xbf16, #tpu.memory_space<vmem>>, vector<1x8x32xbf16>
    %178 = vector.shape_cast %177 : vector<1x8x32xbf16> to vector<8x32xbf16>
    %cst_120 = arith.constant dense<0.000000e+00> : vector<8x32xf32>
    %179 = tpu.matmul %176, %178, %cst_120 {dimension_numbers = #tpu.dot_dimension_numbers<[1], [0], [0], [1], [0, 0, 1, 1], [], []>} : vector<8x8xbf16>, vector<8x32xbf16>, vector<8x32xf32> -> vector<8x32xf32>
    %180 = arith.addf %136, %179 : vector<8x32xf32>
    %181 = arith.addf %1, %180 : vector<8x32xf32>
    %c0_121 = arith.constant 0 : index
    %c0_122 = arith.constant 0 : index
    %182 = vector.load %arg10[%c0_121, %c0_122] : memref<1x32xf32, #tpu.memory_space<vmem>>, vector<1x32xf32>
    %183 = vector.broadcast %182 : vector<1x32xf32> to vector<8x32xf32>
    %184 = arith.addf %181, %183 : vector<8x32xf32>
    %c0_123 = arith.constant 0 : index
    %c0_124 = arith.constant 0 : index
    %185 = vector.load %arg11[%c0_123, %c0_124] : memref<1x32xf32, #tpu.memory_space<vmem>>, vector<1x32xf32>
    %c0_125 = arith.constant 0 : index
    %c0_126 = arith.constant 0 : index
    %186 = vector.load %arg12[%c0_125, %c0_126] : memref<1x32xf32, #tpu.memory_space<vmem>>, vector<1x32xf32>
    %cst_127 = arith.constant dense<0.000000e+00> : vector<8xf32>
    %187 = vector.multi_reduction <add>, %184, %cst_127 [1] : vector<8x32xf32> to vector<8xf32>
    %188 = vector.shape_cast %187 : vector<8xf32> to vector<8x1xf32>
    %cst_128 = arith.constant 3.200000e+01 : f32
    %189 = vector.broadcast %cst_128 : f32 to vector<8x1xf32>
    %190 = arith.divf %188, %189 : vector<8x1xf32>
    %191 = vector.broadcast %190 : vector<8x1xf32> to vector<8x32xf32>
    %192 = arith.subf %184, %191 : vector<8x32xf32>
    %193 = arith.mulf %192, %192 : vector<8x32xf32>
    %cst_129 = arith.constant dense<0.000000e+00> : vector<8xf32>
    %194 = vector.multi_reduction <add>, %193, %cst_129 [1] : vector<8x32xf32> to vector<8xf32>
    %195 = vector.shape_cast %194 : vector<8xf32> to vector<8x1xf32>
    %cst_130 = arith.constant 3.200000e+01 : f32
    %196 = vector.broadcast %cst_130 : f32 to vector<8x1xf32>
    %197 = arith.divf %195, %196 : vector<8x1xf32>
    %cst_131 = arith.constant 9.99999974E-6 : f32
    %198 = vector.broadcast %cst_131 : f32 to vector<8x1xf32>
    %199 = arith.addf %197, %198 : vector<8x1xf32>
    %200 = math.rsqrt %199 : vector<8x1xf32>
    %201 = vector.broadcast %200 : vector<8x1xf32> to vector<8x32xf32>
    %202 = arith.mulf %192, %201 : vector<8x32xf32>
    %203 = vector.broadcast %185 : vector<1x32xf32> to vector<8x32xf32>
    %204 = arith.mulf %202, %203 : vector<8x32xf32>
    %205 = vector.broadcast %186 : vector<1x32xf32> to vector<8x32xf32>
    %206 = arith.addf %204, %205 : vector<8x32xf32>
    %c0_132 = arith.constant 0 : index
    %c0_133 = arith.constant 0 : index
    %c0_134 = arith.constant 0 : index
    %207 = vector.load %arg13[%c0_132, %c0_133, %c0_134] : memref<1x8x32xf32, #tpu.memory_space<vmem>>, vector<1x8x32xf32>
    %208 = vector.shape_cast %207 : vector<1x8x32xf32> to vector<8x32xf32>
    %209 = vector.shape_cast %206 : vector<8x32xf32> to vector<1x8x32xf32>
    tpu.vector_store %arg13[%c0_132, %c0_133, %c0_134], %209 {strides = array<i32>} : memref<1x8x32xf32, #tpu.memory_space<vmem>>, vector<1x8x32xf32>,
    return
  }
  func.func @transform_0(%arg0: i32) -> (i32, i32, i32) {
    %c0_i32 = arith.constant 0 : i32
    %c0_i32_0 = arith.constant 0 : i32
    %c0_i32_1 = arith.constant 0 : i32
    return %arg0, %c0_i32, %c0_i32_0 : i32, i32, i32
  }
  func.func @transform_1(%arg0: i32) -> (i32, i32, i32) {
    %c0_i32 = arith.constant 0 : i32
    %c0_i32_0 = arith.constant 0 : i32
    %c0_i32_1 = arith.constant 0 : i32
    return %arg0, %c0_i32, %c0_i32_0 : i32, i32, i32
  }
  func.func @transform_2(%arg0: i32) -> (i32, i32, i32) {
    %c0_i32 = arith.constant 0 : i32
    %c0_i32_0 = arith.constant 0 : i32
    %c0_i32_1 = arith.constant 0 : i32
    %c0_i32_2 = arith.constant 0 : i32
    return %c0_i32, %c0_i32_0, %c0_i32_1 : i32, i32, i32
  }
  func.func @transform_3(%arg0: i32) -> (i32, i32, i32) {
    %c0_i32 = arith.constant 0 : i32
    %c0_i32_0 = arith.constant 0 : i32
    %c0_i32_1 = arith.constant 0 : i32
    %c0_i32_2 = arith.constant 0 : i32
    return %c0_i32, %c0_i32_0, %c0_i32_1 : i32, i32, i32
  }
  func.func @transform_4(%arg0: i32) -> (i32, i32, i32) {
    %c0_i32 = arith.constant 0 : i32
    %c0_i32_0 = arith.constant 0 : i32
    %c0_i32_1 = arith.constant 0 : i32
    %c0_i32_2 = arith.constant 0 : i32
    return %c0_i32, %c0_i32_0, %c0_i32_1 : i32, i32, i32
  }
  func.func @transform_5(%arg0: i32) -> (i32, i32, i32) {
    %c0_i32 = arith.constant 0 : i32
    %c0_i32_0 = arith.constant 0 : i32
    %c0_i32_1 = arith.constant 0 : i32
    %c0_i32_2 = arith.constant 0 : i32
    return %c0_i32, %c0_i32_0, %c0_i32_1 : i32, i32, i32
  }
  func.func @transform_6(%arg0: i32) -> (i32, i32, i32) {
    %c0_i32 = arith.constant 0 : i32
    %c0_i32_0 = arith.constant 0 : i32
    %c0_i32_1 = arith.constant 0 : i32
    %c0_i32_2 = arith.constant 0 : i32
    return %c0_i32, %c0_i32_0, %c0_i32_1 : i32, i32, i32
  }
  func.func @transform_7(%arg0: i32) -> (i32, i32, i32) {
    %c0_i32 = arith.constant 0 : i32
    %c0_i32_0 = arith.constant 0 : i32
    %c0_i32_1 = arith.constant 0 : i32
    %c0_i32_2 = arith.constant 0 : i32
    return %c0_i32, %c0_i32_0, %c0_i32_1 : i32, i32, i32
  }
  func.func @transform_8(%arg0: i32) -> (i32, i32, i32) {
    %c0_i32 = arith.constant 0 : i32
    %c0_i32_0 = arith.constant 0 : i32
    %c0_i32_1 = arith.constant 0 : i32
    %c0_i32_2 = arith.constant 0 : i32
    return %c0_i32, %c0_i32_0, %c0_i32_1 : i32, i32, i32
  }
  func.func @transform_9(%arg0: i32) -> (i32, i32) {
    %c0_i32 = arith.constant 0 : i32
    %c0_i32_0 = arith.constant 0 : i32
    %c0_i32_1 = arith.constant 0 : i32
    return %c0_i32, %c0_i32_0 : i32, i32
  }
  func.func @transform_10(%arg0: i32) -> (i32, i32) {
    %c0_i32 = arith.constant 0 : i32
    %c0_i32_0 = arith.constant 0 : i32
    %c0_i32_1 = arith.constant 0 : i32
    return %c0_i32, %c0_i32_0 : i32, i32
  }
  func.func @transform_11(%arg0: i32) -> (i32, i32) {
    %c0_i32 = arith.constant 0 : i32
    %c0_i32_0 = arith.constant 0 : i32
    %c0_i32_1 = arith.constant 0 : i32
    return %c0_i32, %c0_i32_0 : i32, i32
  }
  func.func @transform_12(%arg0: i32) -> (i32, i32, i32) {
    %c0_i32 = arith.constant 0 : i32
    %c0_i32_0 = arith.constant 0 : i32
    %c0_i32_1 = arith.constant 0 : i32
    return %arg0, %c0_i32, %c0_i32_0 : i32, i32, i32
  }
}

module attributes {stable_mosaic.version = 11 : i64} {
  func.func @_ffn_kernel(%arg0: i32, %arg1: memref<1x8x32xf32, #tpu.memory_space<vmem>>, %arg2: memref<32x64xbf16, #tpu.memory_space<vmem>>, %arg3: memref<1x64xf32, #tpu.memory_space<vmem>>, %arg4: memref<64x32xbf16, #tpu.memory_space<vmem>>, %arg5: memref<1x32xf32, #tpu.memory_space<vmem>>, %arg6: memref<1x32xf32, #tpu.memory_space<vmem>>, %arg7: memref<1x32xf32, #tpu.memory_space<vmem>>, %arg8: memref<1x8x32xf32, #tpu.memory_space<vmem>>) attributes {dimension_semantics = [#tpu.dimension_semantics<parallel>], iteration_bounds = array<i64: 2>, scalar_prefetch = 0 : i64, scratch_operands = 0 : i64, tpu.core_type = #tpu.core_type<tc>, window_params = [{transform_indices = @transform_0, window_bounds = array<i64: 1, 8, 32>}, {pipeline_mode = #tpu.pipeline_mode<synchronous>, transform_indices = @transform_1, window_bounds = array<i64: 32, 64>}, {pipeline_mode = #tpu.pipeline_mode<synchronous>, transform_indices = @transform_2, window_bounds = array<i64: 1, 64>}, {pipeline_mode = #tpu.pipeline_mode<synchronous>, transform_indices = @transform_3, window_bounds = array<i64: 64, 32>}, {pipeline_mode = #tpu.pipeline_mode<synchronous>, transform_indices = @transform_4, window_bounds = array<i64: 1, 32>}, {pipeline_mode = #tpu.pipeline_mode<synchronous>, transform_indices = @transform_5, window_bounds = array<i64: 1, 32>}, {pipeline_mode = #tpu.pipeline_mode<synchronous>, transform_indices = @transform_6, window_bounds = array<i64: 1, 32>}, {transform_indices = @transform_7, window_bounds = array<i64: 1, 8, 32>}]} {
    %c0 = arith.constant 0 : index
    %c0_0 = arith.constant 0 : index
    %c0_1 = arith.constant 0 : index
    %0 = vector.load %arg1[%c0, %c0_0, %c0_1] : memref<1x8x32xf32, #tpu.memory_space<vmem>>, vector<1x8x32xf32>
    %1 = vector.shape_cast %0 : vector<1x8x32xf32> to vector<8x32xf32>
    %2 = arith.truncf %1 : vector<8x32xf32> to vector<8x32xbf16>
    %c0_2 = arith.constant 0 : index
    %c0_3 = arith.constant 0 : index
    %3 = vector.load %arg2[%c0_2, %c0_3] : memref<32x64xbf16, #tpu.memory_space<vmem>>, vector<32x64xbf16>
    %cst = arith.constant dense<0.000000e+00> : vector<8x64xf32>
    %4 = tpu.matmul %2, %3, %cst {dimension_numbers = #tpu.dot_dimension_numbers<[1], [0], [0], [1], [0, 0, 1, 1], [], []>} : vector<8x32xbf16>, vector<32x64xbf16>, vector<8x64xf32> -> vector<8x64xf32>
    %c0_4 = arith.constant 0 : index
    %c0_5 = arith.constant 0 : index
    %5 = vector.load %arg3[%c0_4, %c0_5] : memref<1x64xf32, #tpu.memory_space<vmem>>, vector<1x64xf32>
    %6 = vector.broadcast %5 : vector<1x64xf32> to vector<8x64xf32>
    %7 = arith.addf %4, %6 : vector<8x64xf32>
    %cst_6 = arith.constant 0.000000e+00 : f32
    %8 = vector.broadcast %cst_6 : f32 to vector<8x64xf32>
    %9 = arith.maximumf %7, %8 : vector<8x64xf32>
    %10 = arith.truncf %9 : vector<8x64xf32> to vector<8x64xbf16>
    %c0_7 = arith.constant 0 : index
    %c0_8 = arith.constant 0 : index
    %11 = vector.load %arg4[%c0_7, %c0_8] : memref<64x32xbf16, #tpu.memory_space<vmem>>, vector<64x32xbf16>
    %cst_9 = arith.constant dense<0.000000e+00> : vector<8x32xf32>
    %12 = tpu.matmul %10, %11, %cst_9 {dimension_numbers = #tpu.dot_dimension_numbers<[1], [0], [0], [1], [0, 0, 1, 1], [], []>} : vector<8x64xbf16>, vector<64x32xbf16>, vector<8x32xf32> -> vector<8x32xf32>
    %c0_10 = arith.constant 0 : index
    %c0_11 = arith.constant 0 : index
    %13 = vector.load %arg5[%c0_10, %c0_11] : memref<1x32xf32, #tpu.memory_space<vmem>>, vector<1x32xf32>
    %14 = vector.broadcast %13 : vector<1x32xf32> to vector<8x32xf32>
    %15 = arith.addf %12, %14 : vector<8x32xf32>
    %16 = arith.addf %1, %15 : vector<8x32xf32>
    %c0_12 = arith.constant 0 : index
    %c0_13 = arith.constant 0 : index
    %17 = vector.load %arg6[%c0_12, %c0_13] : memref<1x32xf32, #tpu.memory_space<vmem>>, vector<1x32xf32>
    %c0_14 = arith.constant 0 : index
    %c0_15 = arith.constant 0 : index
    %18 = vector.load %arg7[%c0_14, %c0_15] : memref<1x32xf32, #tpu.memory_space<vmem>>, vector<1x32xf32>
    %cst_16 = arith.constant dense<0.000000e+00> : vector<8xf32>
    %19 = vector.multi_reduction <add>, %16, %cst_16 [1] : vector<8x32xf32> to vector<8xf32>
    %20 = vector.shape_cast %19 : vector<8xf32> to vector<8x1xf32>
    %cst_17 = arith.constant 3.200000e+01 : f32
    %21 = vector.broadcast %cst_17 : f32 to vector<8x1xf32>
    %22 = arith.divf %20, %21 : vector<8x1xf32>
    %23 = vector.broadcast %22 : vector<8x1xf32> to vector<8x32xf32>
    %24 = arith.subf %16, %23 : vector<8x32xf32>
    %25 = arith.mulf %24, %24 : vector<8x32xf32>
    %cst_18 = arith.constant dense<0.000000e+00> : vector<8xf32>
    %26 = vector.multi_reduction <add>, %25, %cst_18 [1] : vector<8x32xf32> to vector<8xf32>
    %27 = vector.shape_cast %26 : vector<8xf32> to vector<8x1xf32>
    %cst_19 = arith.constant 3.200000e+01 : f32
    %28 = vector.broadcast %cst_19 : f32 to vector<8x1xf32>
    %29 = arith.divf %27, %28 : vector<8x1xf32>
    %cst_20 = arith.constant 9.99999974E-6 : f32
    %30 = vector.broadcast %cst_20 : f32 to vector<8x1xf32>
    %31 = arith.addf %29, %30 : vector<8x1xf32>
    %32 = math.rsqrt %31 : vector<8x1xf32>
    %33 = vector.broadcast %32 : vector<8x1xf32> to vector<8x32xf32>
    %34 = arith.mulf %24, %33 : vector<8x32xf32>
    %35 = vector.broadcast %17 : vector<1x32xf32> to vector<8x32xf32>
    %36 = arith.mulf %34, %35 : vector<8x32xf32>
    %37 = vector.broadcast %18 : vector<1x32xf32> to vector<8x32xf32>
    %38 = arith.addf %36, %37 : vector<8x32xf32>
    %c0_21 = arith.constant 0 : index
    %c0_22 = arith.constant 0 : index
    %c0_23 = arith.constant 0 : index
    %39 = vector.load %arg8[%c0_21, %c0_22, %c0_23] : memref<1x8x32xf32, #tpu.memory_space<vmem>>, vector<1x8x32xf32>
    %40 = vector.shape_cast %39 : vector<1x8x32xf32> to vector<8x32xf32>
    %41 = vector.shape_cast %38 : vector<8x32xf32> to vector<1x8x32xf32>
    tpu.vector_store %arg8[%c0_21, %c0_22, %c0_23], %41 {strides = array<i32>} : memref<1x8x32xf32, #tpu.memory_space<vmem>>, vector<1x8x32xf32>,
    return
  }
  func.func @transform_0(%arg0: i32) -> (i32, i32, i32) {
    %c0_i32 = arith.constant 0 : i32
    %c0_i32_0 = arith.constant 0 : i32
    %c0_i32_1 = arith.constant 0 : i32
    return %arg0, %c0_i32, %c0_i32_0 : i32, i32, i32
  }
  func.func @transform_1(%arg0: i32) -> (i32, i32) {
    %c0_i32 = arith.constant 0 : i32
    %c0_i32_0 = arith.constant 0 : i32
    %c0_i32_1 = arith.constant 0 : i32
    return %c0_i32, %c0_i32_0 : i32, i32
  }
  func.func @transform_2(%arg0: i32) -> (i32, i32) {
    %c0_i32 = arith.constant 0 : i32
    %c0_i32_0 = arith.constant 0 : i32
    %c0_i32_1 = arith.constant 0 : i32
    return %c0_i32, %c0_i32_0 : i32, i32
  }
  func.func @transform_3(%arg0: i32) -> (i32, i32) {
    %c0_i32 = arith.constant 0 : i32
    %c0_i32_0 = arith.constant 0 : i32
    %c0_i32_1 = arith.constant 0 : i32
    return %c0_i32, %c0_i32_0 : i32, i32
  }
  func.func @transform_4(%arg0: i32) -> (i32, i32) {
    %c0_i32 = arith.constant 0 : i32
    %c0_i32_0 = arith.constant 0 : i32
    %c0_i32_1 = arith.constant 0 : i32
    return %c0_i32, %c0_i32_0 : i32, i32
  }
  func.func @transform_5(%arg0: i32) -> (i32, i32) {
    %c0_i32 = arith.constant 0 : i32
    %c0_i32_0 = arith.constant 0 : i32
    %c0_i32_1 = arith.constant 0 : i32
    return %c0_i32, %c0_i32_0 : i32, i32
  }
  func.func @transform_6(%arg0: i32) -> (i32, i32) {
    %c0_i32 = arith.constant 0 : i32
    %c0_i32_0 = arith.constant 0 : i32
    %c0_i32_1 = arith.constant 0 : i32
    return %c0_i32, %c0_i32_0 : i32, i32
  }
  func.func @transform_7(%arg0: i32) -> (i32, i32, i32) {
    %c0_i32 = arith.constant 0 : i32
    %c0_i32_0 = arith.constant 0 : i32
    %c0_i32_1 = arith.constant 0 : i32
    return %arg0, %c0_i32, %c0_i32_0 : i32, i32, i32
  }
}

module attributes {stable_mosaic.version = 11 : i64} {
  func.func @_tiled_linear_kernel(%arg0: i32, %arg1: i32, %arg2: i32, %arg3: memref<16x32xf32, #tpu.memory_space<vmem>>, %arg4: memref<32x32xbf16, #tpu.memory_space<vmem>>, %arg5: memref<1x32xf32, #tpu.memory_space<vmem>>, %arg6: memref<16x32xf32, #tpu.memory_space<vmem>>, %arg7: memref<16x32xf32, #tpu.memory_space<vmem>>) attributes {dimension_semantics = [#tpu.dimension_semantics<parallel>, #tpu.dimension_semantics<parallel>, #tpu.dimension_semantics<arbitrary>], iteration_bounds = array<i64: 1, 1, 1>, scalar_prefetch = 0 : i64, scratch_operands = 1 : i64, tpu.core_type = #tpu.core_type<tc>, window_params = [{transform_indices = @transform_0, window_bounds = array<i64: 16, 32>}, {transform_indices = @transform_1, window_bounds = array<i64: 32, 32>}, {transform_indices = @transform_2, window_bounds = array<i64: 1, 32>}, {transform_indices = @transform_3, window_bounds = array<i64: 16, 32>}]} {
    %c0_i32 = arith.constant 0 : i32
    %0 = arith.cmpi eq, %arg2, %c0_i32 : i32
    %1 = arith.extui %0 : i1 to i32
    %c0_i32_0 = arith.constant 0 : i32
    %2 = arith.cmpi ne, %1, %c0_i32_0 : i32
    scf.if %2 {
      %cst_10 = arith.constant 0.000000e+00 : f32
      %13 = vector.broadcast %cst_10 : f32 to vector<16x32xf32>
      %c0_11 = arith.constant 0 : index
      %c0_12 = arith.constant 0 : index
      %14 = vector.load %arg7[%c0_11, %c0_12] : memref<16x32xf32, #tpu.memory_space<vmem>>, vector<16x32xf32>
      tpu.vector_store %arg7[%c0_11, %c0_12], %13 {strides = array<i32>} : memref<16x32xf32, #tpu.memory_space<vmem>>, vector<16x32xf32>,
    } else {
    }
    %c0 = arith.constant 0 : index
    %c0_1 = arith.constant 0 : index
    %3 = vector.load %arg7[%c0, %c0_1] : memref<16x32xf32, #tpu.memory_space<vmem>>, vector<16x32xf32>
    %c0_2 = arith.constant 0 : index
    %c0_3 = arith.constant 0 : index
    %4 = vector.load %arg3[%c0_2, %c0_3] : memref<16x32xf32, #tpu.memory_space<vmem>>, vector<16x32xf32>
    %5 = arith.truncf %4 : vector<16x32xf32> to vector<16x32xbf16>
    %c0_4 = arith.constant 0 : index
    %c0_5 = arith.constant 0 : index
    %6 = vector.load %arg4[%c0_4, %c0_5] : memref<32x32xbf16, #tpu.memory_space<vmem>>, vector<32x32xbf16>
    %cst = arith.constant dense<0.000000e+00> : vector<16x32xf32>
    %7 = tpu.matmul %5, %6, %cst {dimension_numbers = #tpu.dot_dimension_numbers<[1], [0], [0], [1], [0, 0, 1, 1], [], []>} : vector<16x32xbf16>, vector<32x32xbf16>, vector<16x32xf32> -> vector<16x32xf32>
    %8 = arith.addf %3, %7 : vector<16x32xf32>
    %c0_6 = arith.constant 0 : index
    %c0_7 = arith.constant 0 : index
    %9 = vector.load %arg7[%c0_6, %c0_7] : memref<16x32xf32, #tpu.memory_space<vmem>>, vector<16x32xf32>
    tpu.vector_store %arg7[%c0_6, %c0_7], %8 {strides = array<i32>} : memref<16x32xf32, #tpu.memory_space<vmem>>, vector<16x32xf32>,
    %c0_i32_8 = arith.constant 0 : i32
    %10 = arith.cmpi eq, %arg2, %c0_i32_8 : i32
    %11 = arith.extui %10 : i1 to i32
    %c0_i32_9 = arith.constant 0 : i32
    %12 = arith.cmpi ne, %11, %c0_i32_9 : i32
    scf.if %12 {
      %c0_10 = arith.constant 0 : index
      %c0_11 = arith.constant 0 : index
      %13 = vector.load %arg7[%c0_10, %c0_11] : memref<16x32xf32, #tpu.memory_space<vmem>>, vector<16x32xf32>
      %c0_12 = arith.constant 0 : index
      %c0_13 = arith.constant 0 : index
      %14 = vector.load %arg5[%c0_12, %c0_13] : memref<1x32xf32, #tpu.memory_space<vmem>>, vector<1x32xf32>
      %15 = vector.broadcast %14 : vector<1x32xf32> to vector<16x32xf32>
      %16 = arith.addf %13, %15 : vector<16x32xf32>
      %c0_14 = arith.constant 0 : index
      %c0_15 = arith.constant 0 : index
      %17 = vector.load %arg6[%c0_14, %c0_15] : memref<16x32xf32, #tpu.memory_space<vmem>>, vector<16x32xf32>
      tpu.vector_store %arg6[%c0_14, %c0_15], %16 {strides = array<i32>} : memref<16x32xf32, #tpu.memory_space<vmem>>, vector<16x32xf32>,
    } else {
    }
    return
  }
  func.func @transform_0(%arg0: i32, %arg1: i32, %arg2: i32) -> (i32, i32) {
    %c0_i32 = arith.constant 0 : i32
    return %arg0, %arg2 : i32, i32
  }
  func.func @transform_1(%arg0: i32, %arg1: i32, %arg2: i32) -> (i32, i32) {
    %c0_i32 = arith.constant 0 : i32
    return %arg2, %arg1 : i32, i32
  }
  func.func @transform_2(%arg0: i32, %arg1: i32, %arg2: i32) -> (i32, i32) {
    %c0_i32 = arith.constant 0 : i32
    %c0_i32_0 = arith.constant 0 : i32
    return %c0_i32, %arg1 : i32, i32
  }
  func.func @transform_3(%arg0: i32, %arg1: i32, %arg2: i32) -> (i32, i32) {
    %c0_i32 = arith.constant 0 : i32
    return %arg0, %arg1 : i32, i32
  }
}

</mosaic_0001>

<bundles_post_ra>
// kernel: speech_feature_decoder_forward.8
= control target key start
LH: loop header
LB: loop body
LE: loop exit
PB: predicated region body
PF: predicated region fallthrough
CT: control target
= control target key end

     0   :  { %vm22_vm0 = vcmask 261120   ;;  %v287_v22 = vmov 0.0   ;;  %s394_s1 = inlined_call_operand.vmem [shape: bf16[256,32], index: 1, kind: input, shape index: {}]   ;;  %s395_s0 = inlined_call_operand.vmem [shape: f32[16,256], index: 0, kind: input, shape index: {}]   ;;  %s396_s2 = inlined_call_operand.vmem [shape: f32[1,32], index: 2, kind: input, shape index: {}]   ;;  %s397_s3 = inlined_call_operand.vmem [shape: f32[16,32], index: 3, kind: input, shape index: {}]   ;;  %s398_s4 = inlined_call_operand.vmem [shape: f32[16,32], index: 4, kind: output, shape index: {}]  }
   0x1   :  { %v271_v0 = vld [vmem:[%s394_s1 + $0x40] sm:$0xff]   ;;  %v273_v2 = vld [vmem:[%s394_s1 + $0x48] sm:$0xff]   ;;  %v275_v4 = vld [vmem:[%s394_s1 + $0x50] sm:$0xff]   ;;  %23 = vst.msk [vmem:[#allocation2] sm:$0xff] %vm22_vm0, %v287_v22 }
   0x2   :  { %v272_v1 = vld [vmem:[%s394_s1] sm:$0xff]   ;;  %248 = vmatprep.subr.bf16.mxu0 %v271_v0  ;;  %v274_v3 = vld [vmem:[%s394_s1 + $0x8] sm:$0xff]   ;;  %v276_v5 = vld [vmem:[%s394_s1 + $0x10] sm:$0xff]   ;;  %24 = vst.msk [vmem:[#allocation2 + $0x8] sm:$0xff] %vm22_vm0, %v287_v22 }
   0x3   :  { %249 = vmatpush3.bf16.msra.mxu0 %v272_v1  ;;  %v277_v6 = vld [vmem:[%s394_s1 + $0x58] sm:$0xff]   ;;  %v279_v8 = vld [vmem:[%s394_s1 + $0x60] sm:$0xff]   ;;  %v281_v10 = vld [vmem:[%s394_s1 + $0x68] sm:$0xff]  }
   0x4   :  { %250 = vmatprep.subr.bf16.mxu0 %v273_v2  ;;  %v278_v7 = vld [vmem:[%s394_s1 + $0x18] sm:$0xff]   ;;  %v280_v9 = vld [vmem:[%s394_s1 + $0x20] sm:$0xff]   ;;  %v28_v11 = vld [vmem:[%s395_s0 + $0x8] sm:$0xff] }
   0x5   :  { %v30_v12 = vld [vmem:[%s395_s0 + $0x18] sm:$0xff]  ;;  %v282_v14 = vld [vmem:[%s394_s1 + $0x28] sm:$0xff]   ;;  %v283_v15 = vld [vmem:[%s394_s1 + $0x70] sm:$0xff]  }
   0x6   :  { %v32_v13 = vpack.c.bf16 %v30_v12, %v28_v11  ;;  %v284_v16 = vld [vmem:[%s394_s1 + $0x30] sm:$0xff]   ;;  %v285_v17 = vld [vmem:[%s394_s1 + $0x78] sm:$0xff]   ;;  %v27_v19 = vld [vmem:[%s395_s0] sm:$0xff] }
   0x7   :  { %251 = vmatpush3.bf16.msra.mxu0 %v274_v3  ;;  %v286_v18 = vld [vmem:[%s394_s1 + $0x38] sm:$0xff]   ;;  %v29_v20 = vld [vmem:[%s395_s0 + $0x10] sm:$0xff]  ;;  %v247_v33 = vld [vmem:[%s396_s2] ss:$0 sm:$0xff] }
   0x8   :  { %252 = vmatprep.subr.bf16.mxu0 %v275_v4  ;;  %193 = vmatprep.mubr.bf16.mxu0 %v32_v13  ;;  %v31_v21 = vpack.c.bf16 %v29_v20, %v27_v19  ;;  %v25_v24 = vld [vmem:[#allocation2] sm:$0xff]  ;;  %v222_v37 = vld [vmem:[%s397_s3 + $0x8] sm:$0xff] }
   0x9   :  { %v26_v28 = vld [vmem:[#allocation2 + $0x8] sm:$0xff]  ;;  %v221_v35 = vld [vmem:[%s397_s3] sm:$0xff] }
   0xb   :  { %253 = vmatpush3.bf16.msra.mxu0 %v276_v5 }
   0xc   :  { %254 = vmatprep.subr.bf16.mxu0 %v277_v6 }
   0xf   :  { %255 = vmatpush3.bf16.msra.mxu0 %v278_v7 }
  0x10   :  { %256 = vmatprep.subr.bf16.mxu0 %v279_v8 }
  0x13   :  { %257 = vmatpush3.bf16.msra.mxu0 %v280_v9 }
  0x14   :  { %258 = vmatprep.subr.bf16.mxu0 %v281_v10 }
  0x17   :  { %259 = vmatpush3.bf16.msra.mxu0 %v282_v14 }
  0x18   :  { %260 = vmatprep.subr.bf16.mxu0 %v283_v15 }
  0x1b   :  { %261 = vmatpush3.bf16.msra.mxu0 %v284_v16 }
  0x1c   :  { %262 = vmatprep.subr.bf16.mxu0 %v285_v17 }
  0x1f   :  { %263 = vmatpush3.bf16.msra.mxu0 %v286_v18 }
  0x22   :  { %194 = vmatmul.mubr.bf16.vlgmr.msra.gmra.mrb[0].mxu0 %v31_v21 }
  0xf5   :  { %v264_v23 = vpop.f32.mrb[0].mxu0 }
  0xf6   :  { %v265_v25 = vpop.f32.mrb[1].mxu0 }
  0xf7   :  { %v266_v26 = vadd.f32 %v265_v25, %v264_v23  ;;  %v267_v27 = vpop.f32.mrb[2].mxu0 }
  0xf8   :  { %v268_v29 = vpop.f32.mrb[3].mxu0 }
  0xf9   :  { %v202_v30 = vadd.f32 %v266_v26, %v25_v24  ;;  %v269_v31 = vadd.f32 %v268_v29, %v267_v27 }
  0xfb   :  { %205 = vst.msk [vmem:[#allocation2] sm:$0xff] %vm22_vm0, %v202_v30  ;;  %v203_v32 = vadd.f32 %v269_v31, %v26_v28 }
  0xfd   :  { %206 = vst.msk [vmem:[#allocation2 + $0x8] sm:$0xff] %vm22_vm0, %v203_v32 }
 0x102   :  { %v210_v34 = vld [vmem:[#allocation2] sm:$0xff] }
 0x103   :  { %v219_v36 = vadd.f32 %v247_v33, %v210_v34 }
 0x104   :  { %v211_v38 = vld [vmem:[#allocation2 + $0x8] sm:$0xff] }
 0x105   :  { %v223_v39 = vadd.f32 %v221_v35, %v219_v36  ;;  %v220_v40 = vadd.f32 %v247_v33, %v211_v38 }
 0x107   :  { %225 = vst.msk [vmem:[%s398_s4] sm:$0xff] %vm22_vm0, %v223_v39  ;;  %v224_v41 = vadd.f32 %v222_v37, %v220_v40 }
 0x109   :  { %226 = vst.msk [vmem:[%s398_s4 + $0x8] sm:$0xff] %vm22_vm0, %v224_v41 }

// kernel: speech_feature_decoder_forward.15
= control target key start
LH: loop header
LB: loop body
LE: loop exit
PB: predicated region body
PF: predicated region fallthrough
CT: control target
= control target key end

     0   :  { %vm19_vm0 = vcmask 261120   ;;  %v131_v0 = vmov 0.0   ;;  %vm132_vm1 = vmmov 0   ;;  %s181_s1 = inlined_call_operand.vmem [shape: bf16[32,32], index: 1, kind: input, shape index: {}]   ;;  %s182_s0 = inlined_call_operand.vmem [shape: f32[16,32], index: 0, kind: input, shape index: {}]   ;;  %s183_s2 = inlined_call_operand.vmem [shape: f32[1,32], index: 2, kind: input, shape index: {}]   ;;  %s184_s3 = inlined_call_operand.vmem [shape: f32[16,32], index: 3, kind: output, shape index: {}]  }
   0x1   :  { %119 = vmatprep.subr.bf16.mxu0 %v131_v0  ;;  %v129_v1 = vld [vmem:[%s181_s1] sm:$0xff]   ;;  %123 = vmatprep.mubr.msk.bf16.mxu0 %vm132_vm1, %v131_v0  ;;  %20 = vst.msk [vmem:[#allocation2] sm:$0xff] %vm19_vm0, %v131_v0  ;;  %21 = vst.msk [vmem:[#allocation2 + $0x8] sm:$0xff] %vm19_vm0, %v131_v0  ;;  %v130_v2 = vld [vmem:[%s181_s1 + $0x8] sm:$0xff]  }
   0x2   :  { %120 = vmatpush3.bf16.msra.mxu0 %v129_v1  ;;  %v24_v3 = vld [vmem:[%s182_s0] sm:$0xff]  ;;  %v25_v4 = vld [vmem:[%s182_s0 + $0x8] sm:$0xff] }
   0x3   :  { %121 = vmatprep.subr.bf16.mxu0 %v131_v0  ;;  %v26_v5 = vpack.c.bf16 %v25_v4, %v24_v3  ;;  %v115_v14 = vld [vmem:[%s183_s2] ss:$0 sm:$0xff] }
   0x6   :  { %122 = vmatpush3.bf16.msra.mxu0 %v130_v2 }
   0x8   :  { %v22_v6 = vld [vmem:[#allocation2] sm:$0xff]  ;;  %v23_v8 = vld [vmem:[#allocation2 + $0x8] sm:$0xff] }
   0x9   :  { %124 = vmatmul.mubr.msk.bf16.vlgmr.msra.gmra.mrb[0].mxu0 %vm19_vm0, %v26_v5 }
  0xdc   :  { %v81_v7 = vpop.f32.mrb[0].mxu0 }
  0xdd   :  { %v88_v9 = vadd.f32 %v81_v7, %v22_v6  ;;  %v125_v10 = vpop.f32.mrb[1].mxu0 }
  0xde   :  { %v84_v11 = vpop.f32.mrb[2].mxu0 }
  0xdf   :  { %90 = vst.msk [vmem:[#allocation2] sm:$0xff] %vm19_vm0, %v88_v9  ;;  %v89_v12 = vadd.f32 %v84_v11, %v23_v8  ;;  %v126_v13 = vpop.f32.mrb[3].mxu0 }
  0xe1   :  { %91 = vst.msk [vmem:[#allocation2 + $0x8] sm:$0xff] %vm19_vm0, %v89_v12 }
  0xe6   :  { %v95_v15 = vld [vmem:[#allocation2] sm:$0xff] }
  0xe7   :  { %v104_v16 = vadd.f32 %v115_v14, %v95_v15 }
  0xe8   :  { %v96_v17 = vld [vmem:[#allocation2 + $0x8] sm:$0xff] }
  0xe9   :  { %106 = vst.msk [vmem:[%s184_s3] sm:$0xff] %vm19_vm0, %v104_v16  ;;  %v105_v18 = vadd.f32 %v115_v14, %v96_v17 }
  0xeb   :  { %107 = vst.msk [vmem:[%s184_s3 + $0x8] sm:$0xff] %vm19_vm0, %v105_v18 }

// kernel: speech_feature_decoder_forward.11
= control target key start
LH: loop header
LB: loop body
LE: loop exit
PB: predicated region body
PF: predicated region fallthrough
CT: control target
= control target key end

     0   :  { %s631_s24 = smov 0   ;;  %s689_s0 = inlined_call_operand.vmem [shape: f32[2,8,32], index: 0, kind: input, shape index: {}]   ;;  %s690_s1 = inlined_call_operand.vmem [shape: bf16[32,64], index: 1, kind: input, shape index: {}]   ;;  %s691_s2 = inlined_call_operand.vmem [shape: f32[1,64], index: 2, kind: input, shape index: {}]   ;;  %s692_s3 = inlined_call_operand.vmem [shape: bf16[64,32], index: 3, kind: input, shape index: {}]   ;;  %s693_s4 = inlined_call_operand.vmem [shape: f32[1,32], index: 4, kind: input, shape index: {}]   ;;  %s694_s5 = inlined_call_operand.vmem [shape: f32[1,32], index: 5, kind: input, shape index: {}]   ;;  %s695_s6 = inlined_call_operand.vmem [shape: f32[1,32], index: 6, kind: input, shape index: {}]   ;;  %s696_s7 = inlined_call_operand.vmem [shape: f32[2,8,32], index: 7, kind: output, shape index: {}]  }
   0x1 LB: > { %s514_s25 = sadd.s32 4294967295, %s587_s24   ;;  %p518_p0 = scmp.ge.s32.totalorder %s587_s24, 1  ;;  %s587_s24 = sphi %s631_s24, %s17_s24  }
   0x2   : > { %p236_p1 = scmp.lt.s32.totalorder %s587_s24, 3 }
   0x4   : > { %p237_p2 = pnand %p518_p0, %p236_p1 }
   0x5   : > { %v573_v0 = vld [vmem:[%s690_s1] sm:$0xff] (!%p237_p2)   ;;  %v589_v1 = vmov (!%p237_p2), 0.0   ;;  %v574_v2 = vld [vmem:[%s690_s1 + $0x8] sm:$0xff] (!%p237_p2)   ;;  %vm590_vm0 = vmmov (!%p237_p2), 0   ;;  %p266_p3 = scmp.lt.s32.totalorder (!%p237_p2), %s514_s25, 1  ;;  %vm300_vm1 = vcmask (!%p237_p2), 261120  }
   0x6   : > { %240 = sbr.rel (%p237_p2) target bundleno = 767 (0x2ff), region = 48  ;;  %543 = vmatprep.subr.bf16.mxu0 (!%p237_p2), %v589_v1  ;;  %551 = vmatprep.subr.bf16.mxu1 (!%p237_p2), %v589_v1  ;;  %v575_v3 = vld [vmem:[%s692_s3] sm:$0xff] (!%p237_p2)   ;;  %v576_v4 = vld [vmem:[%s692_s3 + $0x8] sm:$0xff] (!%p237_p2)   ;;  %v577_v7 = vld [vmem:[%s692_s3 + $0x10] sm:$0xff] (!%p237_p2)   ;;  %vm385_vm2 = vcmask (!%p237_p2), 523264  }
   0x7   : > { %544 = vmatpush3.bf16.msra.mxu0 (!%p237_p2), %v573_v0  ;;  %547 = vmatprep.mubr.msk.bf16.mxu0 (!%p237_p2), %vm590_vm0, %v589_v1  ;;  %v578_v8 = vld [vmem:[%s692_s3 + $0x18] sm:$0xff] (!%p237_p2)   ;;  %v521_v9 = vld [vmem:[%s691_s2] ss:$0 sm:$0xff] (!%p237_p2) }
   0x8   : > { %545 = vmatprep.subr.bf16.mxu0 (!%p237_p2), %v589_v1  ;;  %559 = vmatprep.mubr.msk.bf16.mxu1 (!%p237_p2), %vm590_vm0, %v589_v1  ;;  %v525_v17 = vld [vmem:[%s693_s4] ss:$0 sm:$0xff] (!%p237_p2) }
   0x9   : > { %552 = vmatpush3.bf16.msra.mxu1 (!%p237_p2), %v575_v3  ;;  %v531_v34 = vld [vmem:[%s694_s5] ss:$0 sm:$0xff] (!%p237_p2) }
   0xa   : > { %553 = vmatprep.subr.bf16.mxu1 (!%p237_p2), %v589_v1  ;;  %v532_v36 = vld [vmem:[%s695_s6] ss:$0 sm:$0xff] (!%p237_p2) }
   0xb   : > { %546 = vmatpush3.bf16.msra.mxu0 (!%p237_p2), %v574_v2 }
   0xd   : > { %s698_s25 = smov (!%p266_p3, %s514_s25), 1  ;;  %554 = vmatpush3.bf16.msra.mxu1 %v576_v4 }
   0xe   : > { %s519_s11 = sshll.u32 %s698_s25, 3  ;;  %555 = vmatprep.subr.bf16.mxu1 %v589_v1 }
   0xf   : > { %s269_s14 = scalar_lea.vmem %s689_s0, %s519_s11  ;;  %s273_s8 = scalar_lea.vmem %s696_s7, %s519_s11 }
  0x10   : > { %v275_v5 = vld [vmem:[%s269_s14] sm:$0xff] }
  0x11   : > { %v276_v6 = vpack.c.bf16 %v275_v5, %v275_v5  ;;  %556 = vmatpush3.bf16.msra.mxu1 %v577_v7 }
  0x12   : > { %557 = vmatprep.subr.bf16.mxu1 %v589_v1 }
  0x13   : > { %548 = vmatmul.mubr.msk.bf16.vlgmr.msra.gmra.mrb[0].mxu0 %vm300_vm1, %v276_v6 }
  0x15   : > { %558 = vmatpush3.bf16.msra.mxu1 %v578_v8 }
  0xe6   : > { %v338_v10 = vpop.f32.mrb[0].mxu0 }
  0xe7   : > { %v339_v11 = vadd.f32 %v521_v9, %v338_v10  ;;  %v549_v12 = vpop.f32.mrb[1].mxu0 }
  0xe8   : > { %v341_v13 = vpop.f32.mrb[2].mxu0 }
  0xe9   : > { %v344_v14 = vmax.f32 %v339_v11, 0.0  ;;  %v550_v15 = vpop.f32.mrb[3].mxu0 }
  0xeb   : > { %v345_v16 = vpack.c.bf16 %v344_v14, %v344_v14 }
  0xed   : > { %560 = vmatmul.mubr.msk.bf16.vlgmr.msra.gmra.mrb[0].mxu1 %vm385_vm2, %v345_v16 }
 0x1c0   : > { %v423_v18 = vpop.f32.mrb[0].mxu1 }
 0x1c1   : > { %v424_v19 = vadd.f32 %v525_v17, %v423_v18  ;;  %v561_v20 = vpop.f32.mrb[1].mxu1 }
 0x1c2   : > { %v426_v21 = vpop.f32.mrb[2].mxu1 }
 0x1c3   : > { %v562_v22 = vpop.f32.mrb[3].mxu1  ;;  %v429_v23 = vadd.f32 %v424_v19, %v275_v5 }
 0x1c5   : > { %v432_v24 = vsel %vm300_vm1, %v429_v23, 0.0 }
 0x1c6   : > { %433 = vadd.xlane.f32.xlu0 %v432_v24 }
 0x253   : > { %v434_v25 = vpop.xlane.xlu0 %433 }
 0x254   : > { %v436_v26 = vmul.f32 0.03125, %v434_v25 }
 0x256   : > { %v437_v27 = vsub.f32 %v429_v23, %v436_v26 }
 0x258   : > { %v438_v28 = vmul.f32 %v437_v27, %v437_v27 }
 0x25a   : > { %v439_v29 = vsel %vm300_vm1, %v438_v28, 0.0 }
 0x25b   : > { %440 = vadd.xlane.f32.xlu0 %v439_v29 }
 0x2e8   : > { %v441_v30 = vpop.xlane.xlu0 %440 }
 0x2e9   : > { %v442_v31 = vmul.f32 0.03125, %v441_v30 }
 0x2eb   : > { %v443_v32 = vadd.f32 1e-05, %v442_v31 }
 0x2ed   : > { %579 = vrsqrt.f32 %v443_v32 }
 0x2f7   : > { %v580_v33 = vpop.eup %579 }
 0x2f8   : > { %v445_v35 = vmul.f32 %v580_v33, %v437_v27 }
 0x2fa   : > { %v452_v37 = vmul.f32 %v531_v34, %v445_v35 }
 0x2fc   : > { %v459_v38 = vadd.f32 %v532_v36, %v452_v37 }
 0x2fe   : > { %460 = vst.msk [vmem:[%s273_s8] sm:$0xff] %vm300_vm1, %v459_v38 }
 0x2ff PF: > { %s17_s24 = sadd.s32 1, %s587_s24  }
 0x300   : > { %p14_p4 = scmp.ge.s32.totalorder %s17_s24, 4  }
 0x302   :  { %16 = sbr.rel (!%p14_p4) target bundleno = 1 (0x1), region = 78 }

// kernel: speech_feature_decoder_forward.9
= control target key start
LH: loop header
LB: loop body
LE: loop exit
PB: predicated region body
PF: predicated region fallthrough
CT: control target
= control target key end

     0   :  { %s2424_s21 = smov 0   ;;  %s2740_s0 = inlined_call_operand.vmem [shape: f32[2,8,32], index: 0, kind: input, shape index: {}, may-alias: {0,1}]   ;;  %s2741_s1 = inlined_call_operand.vmem [shape: f32[2,8,32], index: 1, kind: input, shape index: {}, may-alias: {0,1}]   ;;  %s2742_s2 = inlined_call_operand.vmem [shape: bf16[4,32,8], index: 2, kind: input, shape index: {}]   ;;  %s2743_s3 = inlined_call_operand.vmem [shape: bf16[4,32,8], index: 3, kind: input, shape index: {}]   ;;  %s2744_s4 = inlined_call_operand.vmem [shape: bf16[4,32,8], index: 4, kind: input, shape index: {}]   ;;  %s2745_s5 = inlined_call_operand.vmem [shape: f32[4,1,8], index: 5, kind: input, shape index: {}]   ;;  %s2746_s6 = inlined_call_operand.vmem [shape: f32[4,1,8], index: 6, kind: input, shape index: {}]   ;;  %s2747_s7 = inlined_call_operand.vmem [shape: f32[4,1,8], index: 7, kind: input, shape index: {}]   ;;  %s2748_s8 = inlined_call_operand.vmem [shape: bf16[4,8,32], index: 8, kind: input, shape index: {}]   ;;  %s2749_s9 = inlined_call_operand.vmem [shape: f32[1,32], index: 9, kind: input, shape index: {}]   ;;  %s2750_s10 = inlined_call_operand.vmem [shape: f32[1,32], index: 10, kind: input, shape index: {}]   ;;  %s2751_s11 = inlined_call_operand.vmem [shape: f32[1,32], index: 11, kind: input, shape index: {}]   ;;  %s2752_s12 = inlined_call_operand.vmem [shape: f32[2,8,32], index: 12, kind: output, shape index: {}]  }
   0x1 LB: > { %s1948_s22 = sadd.s32 4294967295, %s2355_s21   ;;  %p1952_p0 = scmp.ge.s32.totalorder %s2355_s21, 1  ;;  %s2355_s21 = sphi %s2424_s21, %s22_s21  }
   0x2   : > { %p370_p1 = scmp.lt.s32.totalorder %s2355_s21, 3 }
   0x4   : > { %p371_p2 = pnand %p1952_p0, %p370_p1 }
   0x5   : > { %v2307_v0 = vld [vmem:[%s2743_s3] sm:$0xff] (!%p371_p2)   ;;  %v2357_v1 = vmov (!%p371_p2), 0.0   ;;  %v2308_v2 = vld [vmem:[%s2743_s3 + $0x8] sm:$0xff] (!%p371_p2)   ;;  %vm2358_vm0 = vmmov (!%p371_p2), 0   ;;  %p414_p3 = scmp.lt.s32.totalorder (!%p371_p2), %s1948_s22, 1  ;;  %vm454_vm1 = vcmask (!%p371_p2), 261120  }
   0x6   : > { %374 = sbr.rel (%p371_p2) target bundleno = 4225 (0x1081), region = 68  ;;  %2137 = vmatprep.subr.bf16.mxu1 (!%p371_p2), %v2357_v1  ;;  %2129 = vmatprep.subr.bf16.mxu0 (!%p371_p2), %v2357_v1  ;;  %v2309_v3 = vld [vmem:[%s2742_s2] sm:$0xff] (!%p371_p2)   ;;  %v2310_v4 = vld [vmem:[%s2742_s2 + $0x8] sm:$0xff] (!%p371_p2)   ;;  %vm629_vm2 = vcmask (!%p371_p2), 64512   ;;  %vm693_vm3 = vcmask (!%p371_p2), 1043456   ;;  %v2315_v45 = vld [vmem:[%s2742_s2 + $0x10] sm:$0xff] (!%p371_p2)  }
   0x7   : > { %2138 = vmatpush3.bf16.msra.mxu1 (!%p371_p2), %v2307_v0  ;;  %2141 = vmatprep.mubr.msk.bf16.mxu1 (!%p371_p2), %vm2358_vm0, %v2357_v1  ;;  %v1960_v9 = vld [vmem:[%s2746_s6] ss:$0 sm:$0xff] (!%p371_p2)  ;;  %v2312_v25 = vld [vmem:[%s2744_s4 + $0x8] sm:$0xff] (!%p371_p2)   ;;  %v2316_v46 = vld [vmem:[%s2742_s2 + $0x18] sm:$0xff] (!%p371_p2)  }
   0x8   : > { %2139 = vmatprep.subr.bf16.mxu1 (!%p371_p2), %v2357_v1  ;;  %2133 = vmatprep.mubr.msk.bf16.mxu0 (!%p371_p2), %vm2358_vm0, %v2357_v1  ;;  %v1956_v16 = vld [vmem:[%s2745_s5] ss:$0 sm:$0xff] (!%p371_p2)  ;;  %v2313_v50 = vld [vmem:[%s2743_s3 + $0x10] sm:$0xff] (!%p371_p2)   ;;  %v2314_v52 = vld [vmem:[%s2743_s3 + $0x18] sm:$0xff] (!%p371_p2)  }
   0x9   : > { %2130 = vmatpush3.bf16.msra.mxu0 (!%p371_p2), %v2309_v3  ;;  %v2311_v24 = vld [vmem:[%s2744_s4] sm:$0xff] (!%p371_p2)  }
   0xa   : > { %2131 = vmatprep.subr.bf16.mxu0 (!%p371_p2), %v2357_v1  ;;  %v1964_v40 = vld [vmem:[%s2747_s7] ss:$0 sm:$0xff] (!%p371_p2)  ;;  %v1984_v61 = vld [vmem:[%s2746_s6 + $0x1] ss:$0 sm:$0xff] (!%p371_p2) }
   0xb   : > { %2140 = vmatpush3.bf16.msra.mxu1 (!%p371_p2), %v2308_v2  ;;  %v1975_v3 = vld [vmem:[%s2745_s5 + $0x1] ss:$0 sm:$0xff] (!%p371_p2) }
   0xc   : > { %2153 = vmatprep.subr.bf16.mxu1 (!%p371_p2), %v2357_v1 }
   0xd   : > { %s2754_s22 = smov (!%p414_p3, %s1948_s22), 1  ;;  %2132 = vmatpush3.bf16.msra.mxu0 %v2310_v4 }
   0xe   : > { %s2452_s13 = sshll.u32 %s2754_s22, 3  ;;  %2145 = vmatprep.subr.bf16.mxu0 %v2357_v1 }
   0xf   : > { %s421_s16 = scalar_lea.vmem %s2741_s1, %s2452_s13  ;;  %s417_s19 = scalar_lea.vmem %s2740_s0, %s2452_s13 }
  0x10   : > { %v428_v5 = vld [vmem:[%s421_s16] sm:$0xff]  ;;  %s425_s20 = scalar_lea.vmem %s2752_s12, %s2452_s13 }
  0x11   : > { %v2463_v6 = vld [vmem:[%s417_s19] sm:$0xff]  ;;  %v2465_v7 = vpack.c.bf16 %v428_v5, %v428_v5 }
  0x12   : > { %v2469_v8 = vpack.c.bf16 %v2463_v6, %v2463_v6 }
  0x13   : > { %2142 = vmatmul.mubr.msk.bf16.vlgmr.msra.gmra.mrb[0].mxu1 %vm454_vm1, %v2465_v7 }
  0x14   : > { %2134 = vmatmul.mubr.msk.bf16.vlgmr.msra.gmra.mrb[0].mxu0 %vm454_vm1, %v2469_v8  ;;  %2155 = vmatprep.mubr.msk.bf16.mxu1 %vm2358_vm0, %v2357_v1 }
  0x15   : > { %2149 = vmatprep.mubr.msk.bf16.mxu0 %vm2358_vm0, %v2357_v1  ;;  %2146 = vmatpush3.bf16.msra.mxu0 %v2311_v24 }
  0x16   : > { %2147 = vmatprep.subr.bf16.mxu0 %v2357_v1 }
  0x19   : > { %2148 = vmatpush3.bf16.msra.mxu0 %v2312_v25 }
  0x1a   : > { %2159 = vmatprep.subr.bf16.mxu0 %v2357_v1 }
  0x1c   : > { %2150 = vmatmul.mubr.msk.bf16.vlgmr.msra.gmra.mrb[4].mxu0 %vm454_vm1, %v2465_v7 }
  0x1d   : > { %2161 = vmatprep.mubr.msk.bf16.mxu0 %vm2358_vm0, %v2357_v1 }
  0xe6   : > { %v558_v10 = vpop.f32.mrb[0].mxu1 }
  0xe7   : > { %v492_v11 = vpop.f32.mrb[0].mxu0  ;;  %v559_v12 = vadd.f32 %v1960_v9, %v558_v10  ;;  %v2143_v13 = vpop.f32.mrb[1].mxu1 }
  0xe8   : > { %v2135_v14 = vpop.f32.mrb[1].mxu0  ;;  %v561_v15 = vpop.f32.mrb[2].mxu1  ;;  %v493_v22 = vadd.f32 %v1956_v16, %v492_v11  ;;  %v2318_v13 = vld [vmem:[%s2744_s4 + $0x18] sm:$0xff]  }
  0xe9   : > { %v495_v17 = vpop.f32.mrb[2].mxu0  ;;  %v628_v18 = vpack.c.bf16 %v559_v12, %v559_v12  ;;  %v2144_v19 = vpop.f32.mrb[3].mxu1  ;;  %v2317_v12 = vld [vmem:[%s2744_s4 + $0x10] sm:$0xff]  }
  0xea   : > { %v2136_v20 = vpop.f32.mrb[3].mxu0  ;;  %v627_v23 = vpack.c.bf16 %v493_v22, %v493_v22 }
  0xeb   : > { %v634_v21 = vsel %vm629_vm2, %v628_v18, 0  ;;  %v1993_v20 = vld [vmem:[%s2747_s7 + $0x1] ss:$0 sm:$0xff] }
  0xec   : > { %2154 = vmatpush3.bf16.xpose.msra.mxu1 %v634_v21 }
  0xed   : > { %2165 = vmatprep.subr.bf16.mxu1 %v2357_v1 }
  0xef   : > { %v621_v37 = vpop.f32.mrb[4].mxu0 }
  0xf0   : > { %v2151_v38 = vpop.f32.mrb[5].mxu0  ;;  %v622_v42 = vadd.f32 %v1964_v40, %v621_v37  ;;  %v738_v37 = vld [vmem:[%s2748_s8] sm:$0xf] }
  0xf1   : > { %v624_v39 = vpop.f32.mrb[6].mxu0  ;;  %v1095_v40 = vsel %vm693_vm3, %v738_v37, 0 }
  0xf2   : > { %v2152_v41 = vpop.f32.mrb[7].mxu0  ;;  %v689_v43 = vpack.c.bf16 %v622_v42, %v622_v42 }
  0xf3   : > { %2156 = vmatmul.mubr.msk.bf16.vlgmr.msra.gmra.mrb[4].mxu1 %vm629_vm2, %v627_v23  ;;  %v2319_v41 = vld [vmem:[%s2743_s3 + $0x20] sm:$0xff]  }
  0xf4   : > { %2169 = vmatprep.mubr.msk.bf16.mxu1 %vm2358_vm0, %v2357_v1  ;;  %v695_v44 = vsel %vm693_vm3, %v689_v43, 0  ;;  %2166 = vmatpush3.bf16.msra.mxu1 %v2315_v45  ;;  %v2320_v43 = vld [vmem:[%s2743_s3 + $0x28] sm:$0xff]   ;;  %v2321_v45 = vld [vmem:[%s2742_s2 + $0x20] sm:$0xff]  }
  0xf5   : > { %2160 = vmatpush3.bf16.msra.mxu0 %v695_v44  ;;  %2167 = vmatprep.subr.bf16.mxu1 %v2357_v1 }
  0xf6   : > { %2173 = vmatprep.subr.bf16.mxu0 %v2357_v1 }
  0xf8   : > { %2168 = vmatpush3.bf16.msra.mxu1 %v2316_v46 }
  0xf9   : > { %2181 = vmatprep.subr.bf16.mxu1 %v2357_v1 }
  0xfb   : > { %2170 = vmatmul.mubr.msk.bf16.vlgmr.msra.gmra.mrb[8].mxu1 %vm454_vm1, %v2469_v8 }
  0xfc   : > { %2185 = vmatprep.mubr.msk.bf16.mxu1 %vm2358_vm0, %v2357_v1  ;;  %2182 = vmatpush3.bf16.msra.mxu1 %v2317_v12 }
  0xfd   : > { %2183 = vmatprep.subr.bf16.mxu1 %v2357_v1 }
 0x100   : > { %2184 = vmatpush3.bf16.msra.mxu1 %v2318_v13 }
 0x101   : > { %2195 = vmatprep.subr.bf16.mxu1 %v2357_v1 }
 0x103   : > { %2186 = vmatmul.mubr.msk.bf16.vlgmr.msra.gmra.mrb[12].mxu1 %vm454_vm1, %v2465_v7 }
 0x104   : > { %2197 = vmatprep.mubr.msk.bf16.mxu1 %vm2358_vm0, %v2357_v1 }
 0x1c6   : > { %v670_v26 = vpop.f32.mrb[4].mxu1 }
 0x1c7   : > { %v676_v27 = vmul.f32 0.35355338, %v670_v26  ;;  %v2157_v28 = vpop.f32.mrb[5].mxu1 }
 0x1c8   : > { %v673_v29 = vpop.f32.mrb[6].mxu1 }
 0x1c9   : > { %v2158_v30 = vpop.f32.mrb[7].mxu1  ;;  %v677_v31 = vsel %vm629_vm2, %v676_v27, -inf }
 0x1ca   : > { %678 = vmax.xlane.f32.xlu0 %v677_v31 }
 0x1ce   : > { %v798_v53 = vpop.f32.mrb[8].mxu1 }
 0x1cf   : > { %v2171_v54 = vpop.f32.mrb[9].mxu1  ;;  %v799_v10 = vadd.f32 %v1975_v3, %v798_v53 }
 0x1d0   : > { %v801_v55 = vpop.f32.mrb[10].mxu1 }
 0x1d1   : > { %v2172_v56 = vpop.f32.mrb[11].mxu1  ;;  %v934_v11 = vpack.c.bf16 %v799_v10, %v799_v10  ;;  %v2016_v55 = vld [vmem:[%s2746_s6 + $0x2] ss:$0 sm:$0xff] }
 0x1d6   : > { %v928_v21 = vpop.f32.mrb[12].mxu1 }
 0x1d7   : > { %v929_v22 = vadd.f32 %v1993_v20, %v928_v21  ;;  %v2187_v23 = vpop.f32.mrb[13].mxu1 }
 0x1d8   : > { %v931_v24 = vpop.f32.mrb[14].mxu1 }
 0x1d9   : > { %v995_v25 = vpack.c.bf16 %v929_v22, %v929_v22  ;;  %v2188_v26 = vpop.f32.mrb[15].mxu1 }
 0x257   : > { %v679_v32 = vpop.xlane.xlu0 %678 }
 0x258   : > { %v680_v33 = vsub.f32 %v676_v27, %v679_v32  ;;  %v1000_v27 = vsel %vm693_vm3, %v995_v25, 0 }
 0x259   : > { %2196 = vmatpush3.bf16.msra.mxu1 %v1000_v27 }
 0x25a   : > { %v681_v34 = vmul.f32 1.442695, %v680_v33  ;;  %2207 = vmatprep.subr.bf16.mxu1 %v2357_v1  ;;  %v1999_v33 = vld [vmem:[%s2748_s8 + $0x4] sm:$0xf] }
 0x25c   : > { %2331 = vpow2.f32 %v681_v34  ;;  %v1049_v34 = vsel %vm693_vm3, %v1999_v33, 0 }
 0x266   : > { %v2332_v35 = vpop.eup %2331 }
 0x267   : > { %v683_v36 = vsel %vm629_vm2, %v2332_v35, 0.0 }
 0x268   : > { %684 = vadd.xlane.f32.xlu0 %v683_v36 }
 0x2f5   : > { %v685_v47 = vpop.xlane.xlu0 %684 }
 0x2f6   : > { %2333 = vrcp.f32 %v685_v47 }
 0x300   : > { %v2334_v48 = vpop.eup %2333 }
 0x301   : > { %v687_v49 = vmul.f32 %v2334_v48, %v2332_v35 }
 0x303   : > { %v688_v51 = vpack.c.bf16 %v687_v49, %v687_v49 }
 0x305   : > { %2162 = vmatmul.mubr.msk.bf16.vlgmr.msra.gmra.mrb[8].mxu0 %vm629_vm2, %v688_v51 }
 0x306   : > { %2174 = vmatpush3.bf16.msra.mxu0 %v2313_v50  ;;  %2177 = vmatprep.mubr.msk.bf16.mxu0 %vm2358_vm0, %v2357_v1  ;;  %v2322_v50 = vld [vmem:[%s2742_s2 + $0x28] sm:$0xff]  }
 0x307   : > { %2175 = vmatprep.subr.bf16.mxu0 %v2357_v1 }
 0x30a   : > { %2176 = vmatpush3.bf16.msra.mxu0 %v2314_v52 }
 0x30b   : > { %2189 = vmatprep.subr.bf16.mxu0 %v2357_v1 }
 0x30d   : > { %2178 = vmatmul.mubr.msk.bf16.vlgmr.msra.gmra.mrb[12].mxu0 %vm454_vm1, %v2465_v7 }
 0x30e   : > { %2191 = vmatprep.mubr.msk.bf16.mxu0 %vm2358_vm0, %v2357_v1 }
 0x3d8   : > { %v2537_v57 = vpop.f32.mrb[8].mxu0 }
 0x3d9   : > { %v2163_v58 = vpop.f32.mrb[9].mxu0  ;;  %v737_v42 = vpack.c.bf16 %v2537_v57, %v2537_v57 }
 0x3da   : > { %v734_v59 = vpop.f32.mrb[10].mxu0 }
 0x3db   : > { %v2164_v60 = vpop.f32.mrb[11].mxu0 }
 0x3e0   : > { %v863_v62 = vpop.f32.mrb[12].mxu0 }
 0x3e1   : > { %v864_v63 = vadd.f32 %v1984_v61, %v863_v62  ;;  %v2179_v0 = vpop.f32.mrb[13].mxu0 }
 0x3e2   : > { %v866_v2 = vpop.f32.mrb[14].mxu0 }
 0x3e3   : > { %v935_v4 = vpack.c.bf16 %v864_v63, %v864_v63  ;;  %v2180_v5 = vpop.f32.mrb[15].mxu0 }
 0x3e4   : > { %v2007_v5 = vld [vmem:[%s2745_s5 + $0x2] ss:$0 sm:$0xff] }
 0x3e5   : > { %v940_v9 = vsel %vm629_vm2, %v935_v4, 0 }
 0x3e6   : > { %2190 = vmatpush3.bf16.xpose.msra.mxu0 %v940_v9 }
 0x3e7   : > { %2201 = vmatprep.subr.bf16.mxu0 %v2357_v1 }
 0x3ed   : > { %2192 = vmatmul.mubr.msk.bf16.vlgmr.msra.gmra.mrb[16].mxu0 %vm629_vm2, %v934_v11 }
 0x3ee   : > { %2203 = vmatprep.mubr.msk.bf16.mxu0 %vm2358_vm0, %v2357_v1  ;;  %2202 = vmatpush3.bf16.msra.mxu0 %v1049_v34 }
 0x3ef   : > { %2213 = vmatprep.subr.bf16.mxu0 %v2357_v1 }
 0x4c0   : > { %v976_v14 = vpop.f32.mrb[16].mxu0 }
 0x4c1   : > { %v982_v15 = vmul.f32 0.35355338, %v976_v14  ;;  %v2193_v16 = vpop.f32.mrb[17].mxu0 }
 0x4c2   : > { %v979_v17 = vpop.f32.mrb[18].mxu0  ;;  %v2324_v16 = vld [vmem:[%s2744_s4 + $0x28] sm:$0xff]  }
 0x4c3   : > { %v2194_v18 = vpop.f32.mrb[19].mxu0  ;;  %v983_v19 = vsel %vm629_vm2, %v982_v15, -inf }
 0x4c4   : > { %984 = vmax.xlane.f32.xlu1 %v983_v19 }
 0x551   : > { %v985_v28 = vpop.xlane.xlu1 %984 }
 0x552   : > { %v986_v29 = vsub.f32 %v982_v15, %v985_v28  ;;  %v2323_v15 = vld [vmem:[%s2744_s4 + $0x20] sm:$0xff]  }
 0x554   : > { %v987_v30 = vmul.f32 1.442695, %v986_v29 }
 0x556   : > { %2335 = vpow2.f32 %v987_v30 }
 0x560   : > { %v2336_v31 = vpop.eup %2335 }
 0x561   : > { %v989_v32 = vsel %vm629_vm2, %v2336_v31, 0.0 }
 0x562   : > { %990 = vadd.xlane.f32.xlu1 %v989_v32 }
 0x5ef   : > { %v991_v35 = vpop.xlane.xlu1 %990 }
 0x5f0   : > { %2337 = vrcp.f32 %v991_v35 }
 0x5fa   : > { %v2338_v36 = vpop.eup %2337 }
 0x5fb   : > { %v993_v38 = vmul.f32 %v2338_v36, %v2336_v31  ;;  %v2025_v31 = vld [vmem:[%s2747_s7 + $0x2] ss:$0 sm:$0xff]  ;;  %v2031_v36 = vld [vmem:[%s2748_s8 + $0x8] sm:$0xf] }
 0x5fc   : > { %v1447_v37 = vsel %vm693_vm3, %v2031_v36, 0 }
 0x5fd   : > { %v994_v39 = vpack.c.bf16 %v993_v38, %v993_v38 }
 0x5ff   : > { %2198 = vmatmul.mubr.msk.bf16.vlgmr.msra.gmra.mrb[16].mxu1 %vm629_vm2, %v994_v39 }
 0x600   : > { %2208 = vmatpush3.bf16.msra.mxu1 %v1095_v40  ;;  %2209 = vmatprep.mubr.msk.bf16.mxu1 %vm2358_vm0, %v2357_v1 }
 0x601   : > { %2221 = vmatprep.subr.bf16.mxu1 %v2357_v1 }
 0x607   : > { %2210 = vmatmul.mubr.msk.bf16.vlgmr.msra.gmra.mrb[20].mxu1 %vm629_vm2, %v737_v42  ;;  %v2327_v42 = vld [vmem:[%s2742_s2 + $0x30] sm:$0xff]  }
 0x608   : > { %2222 = vmatpush3.bf16.msra.mxu1 %v2319_v41  ;;  %2225 = vmatprep.mubr.msk.bf16.mxu1 %vm2358_vm0, %v2357_v1 }
 0x609   : > { %2223 = vmatprep.subr.bf16.mxu1 %v2357_v1 }
 0x60c   : > { %2224 = vmatpush3.bf16.msra.mxu1 %v2320_v43  ;;  %v2328_v43 = vld [vmem:[%s2742_s2 + $0x38] sm:$0xff]  }
 0x60d   : > { %2237 = vmatprep.subr.bf16.mxu1 %v2357_v1 }
 0x60f   : > { %2226 = vmatmul.mubr.msk.bf16.vlgmr.msra.gmra.mrb[24].mxu1 %vm454_vm1, %v2465_v7 }
 0x610   : > { %2239 = vmatprep.mubr.msk.bf16.mxu1 %vm2358_vm0, %v2357_v1 }
 0x6d2   : > { %v1036_v44 = vpop.f32.mrb[16].mxu1 }
 0x6d3   : > { %v1042_v46 = vpack.c.bf16 %v1036_v44, %v1036_v44  ;;  %v2199_v47 = vpop.f32.mrb[17].mxu1 }
 0x6d4   : > { %v1039_v48 = vpop.f32.mrb[18].mxu1 }
 0x6d5   : > { %v2200_v49 = vpop.f32.mrb[19].mxu1  ;;  %2204 = vmatmul.mubr.msk.bf16.vlgmr.msra.gmra.mrb[20].mxu0 %vm629_vm2, %v1042_v46 }
 0x6d6   : > { %2214 = vmatpush3.bf16.msra.mxu0 %v2321_v45  ;;  %2217 = vmatprep.mubr.msk.bf16.mxu0 %vm2358_vm0, %v2357_v1  ;;  %v2325_v45 = vld [vmem:[%s2743_s3 + $0x30] sm:$0xff]  }
 0x6d7   : > { %2215 = vmatprep.subr.bf16.mxu0 %v2357_v1 }
 0x6da   : > { %v1131_v51 = vpop.f32.mrb[20].mxu1  ;;  %2216 = vmatpush3.bf16.msra.mxu0 %v2322_v50  ;;  %v2326_v50 = vld [vmem:[%s2743_s3 + $0x38] sm:$0xff]  }
 0x6db   : > { %v2211_v52 = vpop.f32.mrb[21].mxu1  ;;  %2229 = vmatprep.subr.bf16.mxu0 %v2357_v1 }
 0x6dc   : > { %v1134_v53 = vpop.f32.mrb[22].mxu1 }
 0x6dd   : > { %v2212_v54 = vpop.f32.mrb[23].mxu1  ;;  %2218 = vmatmul.mubr.msk.bf16.vlgmr.msra.gmra.mrb[24].mxu0 %vm454_vm1, %v2469_v8 }
 0x6de   : > { %2233 = vmatprep.mubr.msk.bf16.mxu0 %vm2358_vm0, %v2357_v1  ;;  %2230 = vmatpush3.bf16.msra.mxu0 %v2323_v15 }
 0x6df   : > { %2231 = vmatprep.subr.bf16.mxu0 %v2357_v1 }
 0x6e2   : > { %v1261_v56 = vpop.f32.mrb[24].mxu1  ;;  %2232 = vmatpush3.bf16.msra.mxu0 %v2324_v16 }
 0x6e3   : > { %v1262_v57 = vadd.f32 %v2016_v55, %v1261_v56  ;;  %v2227_v58 = vpop.f32.mrb[25].mxu1  ;;  %2243 = vmatprep.subr.bf16.mxu0 %v2357_v1 }
 0x6e4   : > { %v1264_v59 = vpop.f32.mrb[26].mxu1 }
 0x6e5   : > { %v1333_v60 = vpack.c.bf16 %v1262_v57, %v1262_v57  ;;  %v2228_v61 = vpop.f32.mrb[27].mxu1  ;;  %2234 = vmatmul.mubr.msk.bf16.vlgmr.msra.gmra.mrb[28].mxu0 %vm454_vm1, %v2465_v7  ;;  %v2047_v59 = vld [vmem:[%s2746_s6 + $0x3] ss:$0 sm:$0xff] }
 0x6e6   : > { %2245 = vmatprep.mubr.msk.bf16.mxu0 %vm2358_vm0, %v2357_v1 }
 0x6e7   : > { %v1338_v62 = vsel %vm629_vm2, %v1333_v60, 0 }
 0x6e8   : > { %2238 = vmatpush3.bf16.xpose.msra.mxu1 %v1338_v62 }
 0x6e9   : > { %2249 = vmatprep.subr.bf16.mxu1 %v2357_v1 }
 0x7a8   : > { %v1085_v63 = vpop.f32.mrb[20].mxu0 }
 0x7a9   : > { %v2619_v0 = vadd.f32 %v1131_v51, %v1085_v63  ;;  %v2205_v2 = vpop.f32.mrb[21].mxu0 }
 0x7aa   : > { %v1088_v3 = vpop.f32.mrb[22].mxu0  ;;  %v2038_v2 = vld [vmem:[%s2745_s5 + $0x3] ss:$0 sm:$0xff] }
 0x7ab   : > { %v2206_v4 = vpop.f32.mrb[23].mxu0 }
 0x7b0   : > { %v1196_v9 = vpop.f32.mrb[24].mxu0 }
 0x7b1   : > { %v1197_v10 = vadd.f32 %v2007_v5, %v1196_v9  ;;  %v2219_v11 = vpop.f32.mrb[25].mxu0 }
 0x7b2   : > { %v1199_v12 = vpop.f32.mrb[26].mxu0  ;;  %v2330_v11 = vld [vmem:[%s2744_s4 + $0x38] sm:$0xff]  }
 0x7b3   : > { %v1332_v13 = vpack.c.bf16 %v1197_v10, %v1197_v10  ;;  %v2220_v14 = vpop.f32.mrb[27].mxu0  ;;  %v2329_v10 = vld [vmem:[%s2744_s4 + $0x30] sm:$0xff]  }
 0x7b5   : > { %2240 = vmatmul.mubr.msk.bf16.vlgmr.msra.gmra.mrb[28].mxu1 %vm629_vm2, %v1332_v13 }
 0x7b6   : > { %2251 = vmatprep.mubr.msk.bf16.mxu1 %vm2358_vm0, %v2357_v1  ;;  %2250 = vmatpush3.bf16.msra.mxu1 %v1447_v37 }
 0x7b7   : > { %2263 = vmatprep.subr.bf16.mxu1 %v2357_v1 }
 0x7b8   : > { %v1326_v28 = vpop.f32.mrb[28].mxu0 }
 0x7b9   : > { %v2235_v29 = vpop.f32.mrb[29].mxu0  ;;  %v1327_v33 = vadd.f32 %v2025_v31, %v1326_v28 }
 0x7ba   : > { %v1329_v30 = vpop.f32.mrb[30].mxu0  ;;  %v2062_v29 = vld [vmem:[%s2748_s8 + $0xc] sm:$0xf] }
 0x7bb   : > { %v2236_v32 = vpop.f32.mrb[31].mxu0  ;;  %v1393_v34 = vpack.c.bf16 %v1327_v33, %v1327_v33  ;;  %v1800_v30 = vsel %vm693_vm3, %v2062_v29, 0 }
 0x7bd   : > { %v1398_v35 = vsel %vm693_vm3, %v1393_v34, 0 }
 0x7be   : > { %2244 = vmatpush3.bf16.msra.mxu0 %v1398_v35 }
 0x7bf   : > { %2255 = vmatprep.subr.bf16.mxu0 %v2357_v1 }
 0x888   : > { %v1374_v17 = vpop.f32.mrb[28].mxu1 }
 0x889   : > { %v1380_v18 = vmul.f32 0.35355338, %v1374_v17  ;;  %v2241_v19 = vpop.f32.mrb[29].mxu1 }
 0x88a   : > { %v1377_v20 = vpop.f32.mrb[30].mxu1 }
 0x88b   : > { %v2242_v21 = vpop.f32.mrb[31].mxu1  ;;  %v1381_v22 = vsel %vm629_vm2, %v1380_v18, -inf }
 0x88c   : > { %1382 = vmax.xlane.f32.xlu0 %v1381_v22 }
 0x919   : > { %v1383_v23 = vpop.xlane.xlu0 %1382 }
 0x91a   : > { %v1384_v24 = vsub.f32 %v1380_v18, %v1383_v23 }
 0x91c   : > { %v1385_v25 = vmul.f32 1.442695, %v1384_v24 }
 0x91e   : > { %2339 = vpow2.f32 %v1385_v25 }
 0x928   : > { %v2340_v26 = vpop.eup %2339 }
 0x929   : > { %v1387_v27 = vsel %vm629_vm2, %v2340_v26, 0.0 }
 0x92a   : > { %1388 = vadd.xlane.f32.xlu1 %v1387_v27 }
 0x9b7   : > { %v1389_v38 = vpop.xlane.xlu1 %1388 }
 0x9b8   : > { %2341 = vrcp.f32 %v1389_v38 }
 0x9c2   : > { %v2342_v39 = vpop.eup %2341 }
 0x9c3   : > { %v1391_v40 = vmul.f32 %v2342_v39, %v2340_v26 }
 0x9c5   : > { %v1392_v41 = vpack.c.bf16 %v1391_v40, %v1391_v40 }
 0x9c7   : > { %2246 = vmatmul.mubr.msk.bf16.vlgmr.msra.gmra.mrb[32].mxu0 %vm629_vm2, %v1392_v41 }
 0x9c8   : > { %2259 = vmatprep.mubr.msk.bf16.mxu0 %vm2358_vm0, %v2357_v1  ;;  %2256 = vmatpush3.bf16.msra.mxu0 %v2327_v42 }
 0x9c9   : > { %2257 = vmatprep.subr.bf16.mxu0 %v2357_v1 }
 0x9cc   : > { %2258 = vmatpush3.bf16.msra.mxu0 %v2328_v43 }
 0x9cd   : > { %2271 = vmatprep.subr.bf16.mxu0 %v2357_v1 }
 0x9cf   : > { %2260 = vmatmul.mubr.msk.bf16.vlgmr.msra.gmra.mrb[36].mxu0 %vm454_vm1, %v2469_v8 }
 0x9d0   : > { %2275 = vmatprep.mubr.msk.bf16.mxu0 %vm2358_vm0, %v2357_v1  ;;  %2272 = vmatpush3.bf16.msra.mxu0 %v2329_v10 }
 0x9d1   : > { %2273 = vmatprep.subr.bf16.mxu0 %v2357_v1 }
 0x9d4   : > { %2274 = vmatpush3.bf16.msra.mxu0 %v2330_v11 }
 0x9d5   : > { %2285 = vmatprep.subr.bf16.mxu0 %v2357_v1 }
 0x9d7   : > { %2276 = vmatmul.mubr.msk.bf16.vlgmr.msra.gmra.mrb[40].mxu0 %vm454_vm1, %v2465_v7 }
 0x9d8   : > { %2287 = vmatprep.mubr.msk.bf16.mxu0 %vm2358_vm0, %v2357_v1 }
 0xa9a   : > { %v1434_v44 = vpop.f32.mrb[32].mxu0 }
 0xa9b   : > { %v1440_v46 = vpack.c.bf16 %v1434_v44, %v1434_v44  ;;  %v2247_v47 = vpop.f32.mrb[33].mxu0  ;;  %v2064_v44 = vld [vmem:[%s2749_s9] ss:$0 sm:$0xff] }
 0xa9c   : > { %v1437_v48 = vpop.f32.mrb[34].mxu0 }
 0xa9d   : > { %v2248_v49 = vpop.f32.mrb[35].mxu0  ;;  %2252 = vmatmul.mubr.msk.bf16.vlgmr.msra.gmra.mrb[32].mxu1 %vm629_vm2, %v1440_v46 }
 0xa9e   : > { %2264 = vmatpush3.bf16.msra.mxu1 %v2325_v45  ;;  %2267 = vmatprep.mubr.msk.bf16.mxu1 %vm2358_vm0, %v2357_v1 }
 0xa9f   : > { %2265 = vmatprep.subr.bf16.mxu1 %v2357_v1 }
 0xaa2   : > { %2266 = vmatpush3.bf16.msra.mxu1 %v2326_v50  ;;  %v1549_v8 = vpop.f32.mrb[36].mxu0 }
 0xaa3   : > { %2279 = vmatprep.subr.bf16.mxu1 %v2357_v1  ;;  %v2261_v51 = vpop.f32.mrb[37].mxu0  ;;  %v1550_v5 = vadd.f32 %v2038_v2, %v1549_v8 }
 0xaa4   : > { %v1552_v52 = vpop.f32.mrb[38].mxu0 }
 0xaa5   : > { %2268 = vmatmul.mubr.msk.bf16.vlgmr.msra.gmra.mrb[36].mxu1 %vm454_vm1, %v2465_v7  ;;  %v2262_v53 = vpop.f32.mrb[39].mxu0  ;;  %v1685_v9 = vpack.c.bf16 %v1550_v5, %v1550_v5 }
 0xaa6   : > { %2281 = vmatprep.mubr.msk.bf16.mxu1 %vm2358_vm0, %v2357_v1 }
 0xaaa   : > { %v1679_v7 = vpop.f32.mrb[40].mxu0 }
 0xaab   : > { %v2277_v23 = vpop.f32.mrb[41].mxu0 }
 0xaac   : > { %v1682_v24 = vpop.f32.mrb[42].mxu0 }
 0xaad   : > { %v2278_v25 = vpop.f32.mrb[43].mxu0 }
 0xb70   : > { %v1483_v54 = vpop.f32.mrb[32].mxu1 }
 0xb71   : > { %v2682_v55 = vadd.f32 %v1483_v54, %v2619_v0  ;;  %v2253_v56 = vpop.f32.mrb[33].mxu1 }
 0xb72   : > { %v1486_v57 = vpop.f32.mrb[34].mxu1 }
 0xb73   : > { %v2254_v58 = vpop.f32.mrb[35].mxu1 }
 0xb74   : > { %v2066_v58 = vld [vmem:[%s2751_s11] ss:$0 sm:$0xff] }
 0xb78   : > { %v1614_v60 = vpop.f32.mrb[36].mxu1 }
 0xb79   : > { %v1615_v61 = vadd.f32 %v2047_v59, %v1614_v60  ;;  %v2269_v62 = vpop.f32.mrb[37].mxu1 }
 0xb7a   : > { %v1617_v63 = vpop.f32.mrb[38].mxu1 }
 0xb7b   : > { %v1686_v3 = vpack.c.bf16 %v1615_v61, %v1615_v61  ;;  %v2270_v4 = vpop.f32.mrb[39].mxu1 }
 0xb7d   : > { %v1691_v0 = vsel %vm629_vm2, %v1686_v3, 0 }
 0xb7e   : > { %2280 = vmatpush3.bf16.xpose.msra.mxu1 %v1691_v0 }
 0xb7f   : > { %2291 = vmatprep.subr.bf16.mxu1 %v2357_v1 }
 0xb85   : > { %2282 = vmatmul.mubr.msk.bf16.vlgmr.msra.gmra.mrb[40].mxu1 %vm629_vm2, %v1685_v9 }
 0xb86   : > { %2293 = vmatprep.mubr.msk.bf16.mxu1 %vm2358_vm0, %v2357_v1  ;;  %v2056_v1 = vld [vmem:[%s2747_s7 + $0x3] ss:$0 sm:$0xff]  ;;  %2292 = vmatpush3.bf16.msra.mxu1 %v1800_v30 }
 0xb87   : > { %v1680_v26 = vadd.f32 %v2056_v1, %v1679_v7 }
 0xb89   : > { %v1746_v27 = vpack.c.bf16 %v1680_v26, %v1680_v26 }
 0xb8b   : > { %v1751_v28 = vsel %vm693_vm3, %v1746_v27, 0 }
 0xb8c   : > { %2286 = vmatpush3.bf16.msra.mxu0 %v1751_v28 }
 0xc58   : > { %v1727_v12 = vpop.f32.mrb[40].mxu1 }
 0xc59   : > { %v1733_v13 = vmul.f32 0.35355338, %v1727_v12  ;;  %v2283_v14 = vpop.f32.mrb[41].mxu1 }
 0xc5a   : > { %v1730_v15 = vpop.f32.mrb[42].mxu1 }
 0xc5b   : > { %v2284_v16 = vpop.f32.mrb[43].mxu1  ;;  %v1734_v17 = vsel %vm629_vm2, %v1733_v13, -inf }
 0xc5c   : > { %1735 = vmax.xlane.f32.xlu0 %v1734_v17 }
 0xce9   : > { %v1736_v18 = vpop.xlane.xlu0 %1735 }
 0xcea   : > { %v1737_v19 = vsub.f32 %v1733_v13, %v1736_v18 }
 0xcec   : > { %v1738_v20 = vmul.f32 1.442695, %v1737_v19 }
 0xcee   : > { %2343 = vpow2.f32 %v1738_v20 }
 0xcf8   : > { %v2344_v21 = vpop.eup %2343 }
 0xcf9   : > { %v1740_v22 = vsel %vm629_vm2, %v2344_v21, 0.0 }
 0xcfa   : > { %1741 = vadd.xlane.f32.xlu1 %v1740_v22 }
 0xd87   : > { %v1742_v31 = vpop.xlane.xlu1 %1741 }
 0xd88   : > { %2345 = vrcp.f32 %v1742_v31 }
 0xd92   : > { %v2346_v32 = vpop.eup %2345 }
 0xd93   : > { %v1744_v33 = vmul.f32 %v2346_v32, %v2344_v21 }
 0xd95   : > { %v1745_v34 = vpack.c.bf16 %v1744_v33, %v1744_v33 }
 0xd97   : > { %2288 = vmatmul.mubr.msk.bf16.vlgmr.msra.gmra.mrb[44].mxu0 %vm629_vm2, %v1745_v34 }
 0xe6a   : > { %v1787_v35 = vpop.f32.mrb[44].mxu0 }
 0xe6b   : > { %v1793_v36 = vpack.c.bf16 %v1787_v35, %v1787_v35  ;;  %v2289_v37 = vpop.f32.mrb[45].mxu0 }
 0xe6c   : > { %v1790_v38 = vpop.f32.mrb[46].mxu0 }
 0xe6d   : > { %v2290_v39 = vpop.f32.mrb[47].mxu0  ;;  %2294 = vmatmul.mubr.msk.bf16.vlgmr.msra.gmra.mrb[44].mxu1 %vm629_vm2, %v1793_v36 }
 0xf40   : > { %v1836_v40 = vpop.f32.mrb[44].mxu1 }
 0xf41   : > { %v1842_v41 = vadd.f32 %v1836_v40, %v2682_v55  ;;  %v2295_v42 = vpop.f32.mrb[45].mxu1 }
 0xf42   : > { %v1839_v43 = vpop.f32.mrb[46].mxu1 }
 0xf43   : > { %v1843_v45 = vadd.f32 %v1842_v41, %v2463_v6  ;;  %v2296_v46 = vpop.f32.mrb[47].mxu1  ;;  %v2065_v6 = vld [vmem:[%s2750_s10] ss:$0 sm:$0xff] }
 0xf45   : > { %v1851_v47 = vadd.f32 %v2064_v44, %v1843_v45 }
 0xf47   : > { %v1854_v48 = vsel %vm454_vm1, %v1851_v47, 0.0 }
 0xf48   : > { %1855 = vadd.xlane.f32.xlu0 %v1854_v48 }
 0xfd5   : > { %v1856_v49 = vpop.xlane.xlu0 %1855 }
 0xfd6   : > { %v1858_v50 = vmul.f32 0.03125, %v1856_v49 }
 0xfd8   : > { %v1859_v8 = vsub.f32 %v1851_v47, %v1858_v50 }
 0xfda   : > { %v1860_v51 = vmul.f32 %v1859_v8, %v1859_v8 }
 0xfdc   : > { %v1861_v52 = vsel %vm454_vm1, %v1860_v51, 0.0 }
 0xfdd   : > { %1862 = vadd.xlane.f32.xlu1 %v1861_v52 }
0x106a   : > { %v1863_v53 = vpop.xlane.xlu1 %1862 }
0x106b   : > { %v1864_v54 = vmul.f32 0.03125, %v1863_v53 }
0x106d   : > { %v1865_v55 = vadd.f32 1e-05, %v1864_v54 }
0x106f   : > { %2347 = vrsqrt.f32 %v1865_v55 }
0x1079   : > { %v2348_v56 = vpop.eup %2347 }
0x107a   : > { %v1867_v57 = vmul.f32 %v2348_v56, %v1859_v8 }
0x107c   : > { %v1874_v59 = vmul.f32 %v2065_v6, %v1867_v57 }
0x107e   : > { %v1881_v60 = vadd.f32 %v2066_v58, %v1874_v59 }
0x1080   : > { %1882 = vst.msk [vmem:[%s425_s20] sm:$0xff] %vm454_vm1, %v1881_v60 }
0x1081 PF: > { %s22_s21 = sadd.s32 1, %s2355_s21  }
0x1082   : > { %p19_p4 = scmp.ge.s32.totalorder %s22_s21, 4  }
0x1084   :  { %21 = sbr.rel (!%p19_p4) target bundleno = 1 (0x1), region = 122 }

</bundles_post_ra>
